<compile_context>
chip_gen: v6e
topology: v6e:2x2x1
jax: 0.10.0
libtpu: 0.0.40
codegen_flags: <defaults>
</compile_context>

<pallas_src>
import functools
import math

import jax
import jax.numpy as jnp
from jax import lax
from jax.experimental import pallas as pl
from jax.experimental.pallas import tpu as pltpu


def uadgn_kernel(feat_ref, adj_ref, dgraph_ref,
                 emb_wt_ref, wslab_ref, bias_ref,
                 loss_ref,
                 *, num_iters, epsilon):
    GB, N, F = feat_ref.shape            # graphs-per-block, nodes, features
    H = emb_wt_ref.shape[1]
    K = F + N                            # fused readout width
    rows = GB * N                        # MXU LHS rows for shared-weight matmuls

    feat3 = feat_ref[...]                # (GB, N, F)
    adj3 = adj_ref[...]                  # (GB, N, N)
    feat2 = feat3.reshape(rows, F)       # (GB*N, F) — merge major dims, minor kept

    wslab = wslab_ref[...]               # (H, 2H + K)
    bias = bias_ref[...]                 # (1, 2H + K)
    conv_w = wslab[:, :2 * H]            # [lin_wt | anti_w_t]
    ro_wt = wslab[:, 2 * H:]             # (H, F+N)
    emb_b = bias[:, :H]
    ro_b = bias[:, 2 * H:]

    # --- emb: Linear(input_dim -> hidden_dim), all graphs in one matmul ------
    x = jnp.dot(feat2, emb_wt_ref[...],
                preferred_element_type=jnp.float32) + emb_b        # (GB*N, H)

    # hoist the (1,H)->(GB*N,H) conv-bias broadcast out of the recurrence
    conv_b = jnp.broadcast_to(bias[:, H:2 * H], (rows, H))

    # --- AntiSymmetricConv (weight sharing: one conv, num_iters iterations) --
    def body(_, xc):
        # one fused MXU push: [xc @ lin_w^T | xc @ anti_w_t]  -> (GB*N, 2H)
        both = jnp.dot(xc, conv_w, preferred_element_type=jnp.float32)
        lin_term = both[:, :H]           # lane offset 0 -> feeds dependent matmul
        anti_term = both[:, H:]          # off critical path (elementwise add only)
        # aggr='add' propagate, per graph: (GB,N,N) @ (GB,N,H)
        neigh = jnp.einsum(
            'gnm,gmh->gnh', adj3, lin_term.reshape(GB, N, H),
            preferred_element_type=jnp.float32).reshape(rows, H)
        conv = anti_term + neigh + conv_b
        return xc + epsilon * jnp.tanh(conv)

    # num_iters is a static Python int; unroll for cross-iteration scheduling.
    x = lax.fori_loop(0, num_iters, body, x, unroll=True)

    # --- fused readout heads + per-graph MSE reconstruction losses -----------
    pred = jnp.maximum(
        jnp.dot(x, ro_wt, preferred_element_type=jnp.float32) + ro_b, 0.0)
    pred3 = pred.reshape(GB, N, K)
    diff_f = pred3[:, :, :F] - feat3                     # vs. features
    diff_a = pred3[:, :, F:] - dgraph_ref[...]           # vs. dense_graph
    per_node = (jnp.sum(diff_f * diff_f, axis=2) * (1.0 / (N * F))
                + jnp.sum(diff_a * diff_a, axis=2) * (1.0 / (N * N)))  # (GB, N)
    loss_ref[...] = jnp.sum(per_node, axis=1, keepdims=True)           # (GB, 1)


def uadgn_forward_batched(features, adj, dense_graph, params, *,
                          num_iters, gamma, epsilon, graphs_per_block=8):
    """Per-graph losses for a batch of graphs: (B, N, F), (B, N, N), (B, N, N) -> (B,)."""
    f32 = jnp.float32
    features = features.astype(f32)
    adj = adj.astype(f32)
    dense_graph = dense_graph.astype(f32)
    B, N, F = features.shape
    H = params["emb_w"].shape[0]

    # largest block size that divides the batch (>=8 fills all vreg sublanes at N=16)
    GB = max(1, min(graphs_per_block, B))
    while B % GB:
        GB -= 1
    num_blocks = B // GB

    # ---- parameter prep (done once, outside the kernel; XLA folds it) -------
    W = params["asym_w"].astype(f32)
    # (W - W^T - gamma*I)^T == W^T - W - gamma*I  (already in (in,out) layout)
    anti_w_t = W.T - W - gamma * jnp.eye(H, dtype=f32)                 # (H, H)
    lin_wt = params["lin_w"].T.astype(f32)                             # (H, H)
    conv_w = jnp.concatenate([lin_wt, anti_w_t], axis=1)               # (H, 2H)
    ro_cat_wt = jnp.concatenate(
        [params["ro_w"].T.astype(f32), params["roa_w"].T.astype(f32)], axis=1)  # (H, F+N)
    w_slab = jnp.concatenate([conv_w, ro_cat_wt], axis=1)              # (H, 2H+F+N)
    bias_pack = jnp.concatenate(
        [params["emb_b"], params["asym_b"],
         params["ro_b"], params["roa_b"]]).reshape(1, -1).astype(f32)  # (1, 2H+F+N)
    emb_wt = params["emb_w"].T.astype(f32)                             # (F, H)

    kernel = functools.partial(uadgn_kernel, num_iters=num_iters, epsilon=epsilon)
    slab_cols = 2 * H + F + N

    loss = pl.pallas_call(
        kernel,
        grid=(num_blocks,),
        in_specs=[
            pl.BlockSpec((GB, N, F), lambda g: (g, 0, 0)),     # features (pipelined)
            pl.BlockSpec((GB, N, N), lambda g: (g, 0, 0)),     # adjacency
            pl.BlockSpec((GB, N, N), lambda g: (g, 0, 0)),     # dense_graph target
            pl.BlockSpec((F, H), lambda g: (0, 0)),            # emb weight (resident)
            pl.BlockSpec((H, slab_cols), lambda g: (0, 0)),    # weight slab (resident)
            pl.BlockSpec((1, slab_cols), lambda g: (0, 0)),    # bias row (resident)
        ],
        out_specs=pl.BlockSpec((GB, 1), lambda g: (g, 0)),
        out_shape=jax.ShapeDtypeStruct((B, 1), jnp.float32),
        compiler_params=pltpu.CompilerParams(
            dimension_semantics=("parallel",)),                 # 2-TC sharding on v7x
    )(features, adj, dense_graph, emb_wt, w_slab, bias_pack)
    return loss[:, 0]


def uadgn_forward(features, adj, dense_graph, params, *,
                  num_iters, gamma, epsilon):
    """Single-graph forward (original module signature) -> scalar loss."""
    losses = uadgn_forward_batched(
        features[None], adj[None], dense_graph[None], params,
        num_iters=num_iters, gamma=gamma, epsilon=epsilon, graphs_per_block=1)
    return losses[0]


def init_params(key, n_nodes, n_features, hidden_dim):
    """Deterministic PyTorch-style uniform(-1/sqrt(fan_in), 1/sqrt(fan_in)) init."""
    def linear(k, out_dim, in_dim):
        kw, kb = jax.random.split(k)
        bound = 1.0 / math.sqrt(in_dim)
        w = jax.random.uniform(kw, (out_dim, in_dim), jnp.float32, -bound, bound)
        b = jax.random.uniform(kb, (out_dim,), jnp.float32, -bound, bound)
        return w, b

    k1, k2, k3, k4, k5 = jax.random.split(key, 5)
    emb_w, emb_b = linear(k1, hidden_dim, n_features)
    asym_w, asym_b = linear(k2, hidden_dim, hidden_dim)       # W + bias
    lin_w, _ = linear(k3, hidden_dim, hidden_dim)             # lin has no bias
    ro_w, ro_b = linear(k4, n_features, hidden_dim)
    roa_w, roa_b = linear(k5, n_nodes, hidden_dim)
    return dict(emb_w=emb_w, emb_b=emb_b, asym_w=asym_w, asym_b=asym_b,
                lin_w=lin_w, ro_w=ro_w, ro_b=ro_b, roa_w=roa_w, roa_b=roa_b)


def uadgn_reference(features, adj, dense_graph, params, *,
                    num_iters, gamma, epsilon):
    """Pure-JAX single-graph reference for validation (mirrors the PyTorch module)."""
    x = features @ params["emb_w"].T + params["emb_b"]
    H = params["asym_w"].shape[0]
    anti = params["asym_w"] - params["asym_w"].T - gamma * jnp.eye(H)
    for _ in range(num_iters):
        neigh = adj @ (x @ params["lin_w"].T)
        conv = x @ anti.T + neigh + params["asym_b"]
        x = x + epsilon * jnp.tanh(conv)
    out = jax.nn.relu(x @ params["ro_w"].T + params["ro_b"])
    adj_hat = jax.nn.relu(x @ params["roa_w"].T + params["roa_b"])
    return jnp.mean((out - features) ** 2) + jnp.mean((adj_hat - dense_graph) ** 2)


if __name__ == "__main__":
    N_NODES = 16       # args.n_nodes
    N_FEATURES = 8     # args.n_features
    HIDDEN = 32        # args.hidden_dim
    NUM_LAYERS = 2     # args.num_layers  (= num_iters, weight_sharing=True)
    GAMMA = 0.1
    EPSILON = 0.1
    BATCH = 16         # graphs processed per pallas_call
    GRAPHS_PER_BLOCK = 8   # 8 graphs x 16 nodes = 128-row MXU LHS per grid step

    key = jax.random.PRNGKey(0)
    k_feat, k_adj, k_par = jax.random.split(key, 3)

    features = jax.random.normal(k_feat, (BATCH, N_NODES, N_FEATURES), jnp.float32)
    # symmetric binary adjacency per graph (dense form of edge_index), also the recon target
    upper_mask = jnp.triu(jnp.ones((N_NODES, N_NODES), jnp.float32), 1)
    bern = (jax.random.uniform(k_adj, (BATCH, N_NODES, N_NODES)) < 0.3).astype(jnp.float32)
    upper = bern * upper_mask
    adj = upper + jnp.swapaxes(upper, 1, 2)
    dense_graph = adj

    params = init_params(k_par, N_NODES, N_FEATURES, HIDDEN)

    # batched (gridded) path: one pallas_call, 2 grid steps x 8 graphs
    losses = uadgn_forward_batched(features, adj, dense_graph, params,
                                   num_iters=NUM_LAYERS, gamma=GAMMA, epsilon=EPSILON,
                                   graphs_per_block=GRAPHS_PER_BLOCK)
    losses = jax.block_until_ready(losses)

    ref_fn = lambda f, a, d: uadgn_reference(f, a, d, params, num_iters=NUM_LAYERS,
                                             gamma=GAMMA, epsilon=EPSILON)
    ref = jax.vmap(ref_fn)(features, adj, dense_graph)
    assert jnp.allclose(losses, ref, rtol=1e-4, atol=1e-5), (losses, ref)

    # single-graph path (original module signature)
    loss1 = uadgn_forward(features[0], adj[0], dense_graph[0], params,
                          num_iters=NUM_LAYERS, gamma=GAMMA, epsilon=EPSILON)
    loss1 = jax.block_until_ready(loss1)
    assert jnp.allclose(loss1, ref[0], rtol=1e-4, atol=1e-5), (loss1, ref[0])

    print("KERNEL_OK")
</pallas_src>

<mosaic_0001>
module attributes {stable_mosaic.version = 11 : i64} {
  func.func @uadgn_kernel(%arg0: i32, %arg1: memref<8x16x8xf32, #tpu.memory_space<vmem>>, %arg2: memref<8x16x16xf32, #tpu.memory_space<vmem>>, %arg3: memref<8x16x16xf32, #tpu.memory_space<vmem>>, %arg4: memref<8x32xf32, #tpu.memory_space<vmem>>, %arg5: memref<32x88xf32, #tpu.memory_space<vmem>>, %arg6: memref<1x88xf32, #tpu.memory_space<vmem>>, %arg7: memref<8x1xf32, #tpu.memory_space<vmem>>) attributes {dimension_semantics = [#tpu.dimension_semantics<parallel>], iteration_bounds = array<i64: 2>, scalar_prefetch = 0 : i64, scratch_operands = 0 : i64, tpu.core_type = #tpu.core_type<tc>, window_params = [{transform_indices = @transform_0, window_bounds = array<i64: 8, 16, 8>}, {transform_indices = @transform_1, window_bounds = array<i64: 8, 16, 16>}, {transform_indices = @transform_2, window_bounds = array<i64: 8, 16, 16>}, {pipeline_mode = #tpu.pipeline_mode<synchronous>, transform_indices = @transform_3, window_bounds = array<i64: 8, 32>}, {pipeline_mode = #tpu.pipeline_mode<synchronous>, transform_indices = @transform_4, window_bounds = array<i64: 32, 88>}, {pipeline_mode = #tpu.pipeline_mode<synchronous>, transform_indices = @transform_5, window_bounds = array<i64: 1, 88>}, {transform_indices = @transform_6, window_bounds = array<i64: 8, 1>}]} {
    %c0 = arith.constant 0 : index
    %c0_0 = arith.constant 0 : index
    %c0_1 = arith.constant 0 : index
    %0 = vector.load %arg1[%c0, %c0_0, %c0_1] : memref<8x16x8xf32, #tpu.memory_space<vmem>>, vector<8x16x8xf32>
    %c0_2 = arith.constant 0 : index
    %c0_3 = arith.constant 0 : index
    %c0_4 = arith.constant 0 : index
    %1 = vector.load %arg2[%c0_2, %c0_3, %c0_4] : memref<8x16x16xf32, #tpu.memory_space<vmem>>, vector<8x16x16xf32>
    %2 = vector.shape_cast %0 : vector<8x16x8xf32> to vector<128x8xf32>
    %c0_5 = arith.constant 0 : index
    %c0_6 = arith.constant 0 : index
    %3 = vector.load %arg5[%c0_5, %c0_6] : memref<32x88xf32, #tpu.memory_space<vmem>>, vector<32x88xf32>
    %c0_7 = arith.constant 0 : index
    %c0_8 = arith.constant 0 : index
    %4 = vector.load %arg6[%c0_7, %c0_8] : memref<1x88xf32, #tpu.memory_space<vmem>>, vector<1x88xf32>
    %5 = vector.extract_strided_slice %3 {offsets = [0, 0], sizes = [32, 64], strides = [1, 1]} : vector<32x88xf32> to vector<32x64xf32>
    %6 = vector.extract_strided_slice %3 {offsets = [0, 64], sizes = [32, 24], strides = [1, 1]} : vector<32x88xf32> to vector<32x24xf32>
    %7 = vector.extract_strided_slice %4 {offsets = [0, 0], sizes = [1, 32], strides = [1, 1]} : vector<1x88xf32> to vector<1x32xf32>
    %8 = vector.extract_strided_slice %4 {offsets = [0, 64], sizes = [1, 24], strides = [1, 1]} : vector<1x88xf32> to vector<1x24xf32>
    %c0_9 = arith.constant 0 : index
    %c0_10 = arith.constant 0 : index
    %9 = vector.load %arg4[%c0_9, %c0_10] : memref<8x32xf32, #tpu.memory_space<vmem>>, vector<8x32xf32>
    %cst = arith.constant dense<0.000000e+00> : vector<128x32xf32>
    %10 = tpu.matmul %2, %9, %cst {dimension_numbers = #tpu.dot_dimension_numbers<[1], [0], [0], [1], [0, 0, 1, 1], [], []>} : vector<128x8xf32>, vector<8x32xf32>, vector<128x32xf32> -> vector<128x32xf32>
    %11 = vector.broadcast %7 : vector<1x32xf32> to vector<128x32xf32>
    %12 = arith.addf %10, %11 : vector<128x32xf32>
    %13 = vector.extract_strided_slice %4 {offsets = [0, 32], sizes = [1, 32], strides = [1, 1]} : vector<1x88xf32> to vector<1x32xf32>
    %14 = vector.shape_cast %13 : vector<1x32xf32> to vector<1x32xf32>
    %15 = vector.broadcast %14 : vector<1x32xf32> to vector<128x32xf32>
    %c0_i32 = arith.constant 0 : i32
    %cst_11 = arith.constant dense<0.000000e+00> : vector<128x64xf32>
    %16 = tpu.matmul %12, %5, %cst_11 {dimension_numbers = #tpu.dot_dimension_numbers<[1], [0], [0], [1], [0, 0, 1, 1], [], []>} : vector<128x32xf32>, vector<32x64xf32>, vector<128x64xf32> -> vector<128x64xf32>
    %17 = vector.extract_strided_slice %16 {offsets = [0, 0], sizes = [128, 32], strides = [1, 1]} : vector<128x64xf32> to vector<128x32xf32>
    %18 = vector.extract_strided_slice %16 {offsets = [0, 32], sizes = [128, 32], strides = [1, 1]} : vector<128x64xf32> to vector<128x32xf32>
    %19 = vector.shape_cast %17 : vector<128x32xf32> to vector<8x16x32xf32>
    "tpu.trace_start"() <{level = 10 : i32, message = "gnm,gmh->gnh"}> : () -> ()
    %cst_12 = arith.constant dense<0.000000e+00> : vector<8x16x32xf32>
    %20 = tpu.matmul %1, %19, %cst_12 {dimension_numbers = #tpu.dot_dimension_numbers<[2], [1], [1], [2], [0, 0, 0, 1, 1, 2], [0], [0]>} : vector<8x16x16xf32>, vector<8x16x32xf32>, vector<8x16x32xf32> -> vector<8x16x32xf32>
    "tpu.trace_stop"() : () -> ()
    %21 = vector.shape_cast %20 : vector<8x16x32xf32> to vector<128x32xf32>
    %22 = arith.addf %18, %21 : vector<128x32xf32>
    %23 = arith.addf %22, %15 : vector<128x32xf32>
    %24 = math.tanh %23 : vector<128x32xf32>
    %cst_13 = arith.constant 1.000000e-01 : f32
    %25 = vector.broadcast %cst_13 : f32 to vector<128x32xf32>
    %26 = arith.mulf %25, %24 : vector<128x32xf32>
    %27 = arith.addf %12, %26 : vector<128x32xf32>
    %c1_i32 = arith.constant 1 : i32
    %cst_14 = arith.constant dense<0.000000e+00> : vector<128x64xf32>
    %28 = tpu.matmul %27, %5, %cst_14 {dimension_numbers = #tpu.dot_dimension_numbers<[1], [0], [0], [1], [0, 0, 1, 1], [], []>} : vector<128x32xf32>, vector<32x64xf32>, vector<128x64xf32> -> vector<128x64xf32>
    %29 = vector.extract_strided_slice %28 {offsets = [0, 0], sizes = [128, 32], strides = [1, 1]} : vector<128x64xf32> to vector<128x32xf32>
    %30 = vector.extract_strided_slice %28 {offsets = [0, 32], sizes = [128, 32], strides = [1, 1]} : vector<128x64xf32> to vector<128x32xf32>
    %31 = vector.shape_cast %29 : vector<128x32xf32> to vector<8x16x32xf32>
    "tpu.trace_start"() <{level = 10 : i32, message = "gnm,gmh->gnh"}> : () -> ()
    %cst_15 = arith.constant dense<0.000000e+00> : vector<8x16x32xf32>
    %32 = tpu.matmul %1, %31, %cst_15 {dimension_numbers = #tpu.dot_dimension_numbers<[2], [1], [1], [2], [0, 0, 0, 1, 1, 2], [0], [0]>} : vector<8x16x16xf32>, vector<8x16x32xf32>, vector<8x16x32xf32> -> vector<8x16x32xf32>
    "tpu.trace_stop"() : () -> ()
    %33 = vector.shape_cast %32 : vector<8x16x32xf32> to vector<128x32xf32>
    %34 = arith.addf %30, %33 : vector<128x32xf32>
    %35 = arith.addf %34, %15 : vector<128x32xf32>
    %36 = math.tanh %35 : vector<128x32xf32>
    %cst_16 = arith.constant 1.000000e-01 : f32
    %37 = vector.broadcast %cst_16 : f32 to vector<128x32xf32>
    %38 = arith.mulf %37, %36 : vector<128x32xf32>
    %39 = arith.addf %27, %38 : vector<128x32xf32>
    %cst_17 = arith.constant dense<0.000000e+00> : vector<128x24xf32>
    %40 = tpu.matmul %39, %6, %cst_17 {dimension_numbers = #tpu.dot_dimension_numbers<[1], [0], [0], [1], [0, 0, 1, 1], [], []>} : vector<128x32xf32>, vector<32x24xf32>, vector<128x24xf32> -> vector<128x24xf32>
    %41 = vector.broadcast %8 : vector<1x24xf32> to vector<128x24xf32>
    %42 = arith.addf %40, %41 : vector<128x24xf32>
    %cst_18 = arith.constant 0.000000e+00 : f32
    %43 = vector.broadcast %cst_18 : f32 to vector<128x24xf32>
    %44 = arith.maximumf %42, %43 : vector<128x24xf32>
    %45 = vector.shape_cast %44 : vector<128x24xf32> to vector<8x16x24xf32>
    %46 = vector.extract_strided_slice %45 {offsets = [0, 0, 0], sizes = [8, 16, 8], strides = [1, 1, 1]} : vector<8x16x24xf32> to vector<8x16x8xf32>
    %47 = arith.subf %46, %0 : vector<8x16x8xf32>
    %48 = vector.extract_strided_slice %45 {offsets = [0, 0, 8], sizes = [8, 16, 16], strides = [1, 1, 1]} : vector<8x16x24xf32> to vector<8x16x16xf32>
    %c0_19 = arith.constant 0 : index
    %c0_20 = arith.constant 0 : index
    %c0_21 = arith.constant 0 : index
    %49 = vector.load %arg3[%c0_19, %c0_20, %c0_21] : memref<8x16x16xf32, #tpu.memory_space<vmem>>, vector<8x16x16xf32>
    %50 = arith.subf %48, %49 : vector<8x16x16xf32>
    %51 = arith.mulf %47, %47 : vector<8x16x8xf32>
    %cst_22 = arith.constant dense<0.000000e+00> : vector<8x16xf32>
    %52 = vector.multi_reduction <add>, %51, %cst_22 [2] : vector<8x16x8xf32> to vector<8x16xf32>
    %cst_23 = arith.constant 7.812500e-03 : f32
    %53 = vector.broadcast %cst_23 : f32 to vector<8x16xf32>
    %54 = arith.mulf %52, %53 : vector<8x16xf32>
    %55 = arith.mulf %50, %50 : vector<8x16x16xf32>
    %cst_24 = arith.constant dense<0.000000e+00> : vector<8x16xf32>
    %56 = vector.multi_reduction <add>, %55, %cst_24 [2] : vector<8x16x16xf32> to vector<8x16xf32>
    %cst_25 = arith.constant 3.906250e-03 : f32
    %57 = vector.broadcast %cst_25 : f32 to vector<8x16xf32>
    %58 = arith.mulf %56, %57 : vector<8x16xf32>
    %59 = arith.addf %54, %58 : vector<8x16xf32>
    %cst_26 = arith.constant dense<0.000000e+00> : vector<8xf32>
    %60 = vector.multi_reduction <add>, %59, %cst_26 [1] : vector<8x16xf32> to vector<8xf32>
    %61 = vector.shape_cast %60 : vector<8xf32> to vector<8x1xf32>
    %c0_27 = arith.constant 0 : index
    %c0_28 = arith.constant 0 : index
    %62 = vector.load %arg7[%c0_27, %c0_28] : memref<8x1xf32, #tpu.memory_space<vmem>>, vector<8x1xf32>
    tpu.vector_store %arg7[%c0_27, %c0_28], %61 {strides = array<i32>} : memref<8x1xf32, #tpu.memory_space<vmem>>, vector<8x1xf32>,
    return
  }
  func.func @transform_0(%arg0: i32) -> (i32, i32, i32) {
    %c0_i32 = arith.constant 0 : i32
    %c0_i32_0 = arith.constant 0 : i32
    %c0_i32_1 = arith.constant 0 : i32
    return %arg0, %c0_i32, %c0_i32_0 : i32, i32, i32
  }
  func.func @transform_1(%arg0: i32) -> (i32, i32, i32) {
    %c0_i32 = arith.constant 0 : i32
    %c0_i32_0 = arith.constant 0 : i32
    %c0_i32_1 = arith.constant 0 : i32
    return %arg0, %c0_i32, %c0_i32_0 : i32, i32, i32
  }
  func.func @transform_2(%arg0: i32) -> (i32, i32, i32) {
    %c0_i32 = arith.constant 0 : i32
    %c0_i32_0 = arith.constant 0 : i32
    %c0_i32_1 = arith.constant 0 : i32
    return %arg0, %c0_i32, %c0_i32_0 : i32, i32, i32
  }
  func.func @transform_3(%arg0: i32) -> (i32, i32) {
    %c0_i32 = arith.constant 0 : i32
    %c0_i32_0 = arith.constant 0 : i32
    %c0_i32_1 = arith.constant 0 : i32
    return %c0_i32, %c0_i32_0 : i32, i32
  }
  func.func @transform_4(%arg0: i32) -> (i32, i32) {
    %c0_i32 = arith.constant 0 : i32
    %c0_i32_0 = arith.constant 0 : i32
    %c0_i32_1 = arith.constant 0 : i32
    return %c0_i32, %c0_i32_0 : i32, i32
  }
  func.func @transform_5(%arg0: i32) -> (i32, i32) {
    %c0_i32 = arith.constant 0 : i32
    %c0_i32_0 = arith.constant 0 : i32
    %c0_i32_1 = arith.constant 0 : i32
    return %c0_i32, %c0_i32_0 : i32, i32
  }
  func.func @transform_6(%arg0: i32) -> (i32, i32) {
    %c0_i32 = arith.constant 0 : i32
    %c0_i32_0 = arith.constant 0 : i32
    return %arg0, %c0_i32 : i32, i32
  }
}

</mosaic_0001>

<bundles_post_ra>
// kernel: tpu_custom_call.1
= control target key start
LH: loop header
LB: loop body
LE: loop exit
PB: predicated region body
PF: predicated region fallthrough
CT: control target
= control target key end

     0   :  { %11 = vsyncpa [#allocation3], 0  ;;  %s5142_s0 = inlined_call_operand.vmem [shape: f32[16,16,8], index: 0, kind: input, shape index: {}]   ;;  %s5143_s1 = inlined_call_operand.vmem [shape: f32[16,16,16], index: 1, kind: input, shape index: {}]   ;;  %s5144_s2 = inlined_call_operand.hbm [shape: f32[16,16,16], index: 2, kind: input, shape index: {}]   ;;  %s5145_s3 = inlined_call_operand.vmem [shape: f32[8,32], index: 3, kind: input, shape index: {}]   ;;  %s5146_s4 = inlined_call_operand.vmem [shape: f32[32,88], index: 4, kind: input, shape index: {}]   ;;  %s5147_s5 = inlined_call_operand.vmem [shape: f32[1,88], index: 5, kind: input, shape index: {}]   ;;  %s5148_s6 = inlined_call_operand.vmem [shape: f32[16,1], index: 6, kind: output, shape index: {}]  }
   0x1   :  { %13 = vsyncpa [#allocation3 + $0x1], 0  ;;  %s4129_s21 = smov 0   ;;  %s4131_s22 = smov 0  }
   0x2   :  { %s4133_s23 = smov 0   ;;  %s4135_s24 = smov 0  }
   0x3 LB: > { %s4148_s25 = sadd.s32 4294967295, %s4084_s24   ;;  %s4151_s26 = sadd.s32 1, %s4084_s24   ;;  %s4084_s24 = sphi %s4135_s24, %s5157_s24   ;;  %s4080_s23 = sphi %s4133_s23, %s5156_s23   ;;  %s4076_s22 = sphi %s4131_s22, %s5155_s22   ;;  %s4072_s21 = sphi %s4129_s21, %s5154_s21  }
   0x4   : > { %s75_s27 = ssub.s32 %s4084_s24, %s4151_s26  ;;  %s78_s28 = sadd.s32 1, %s4080_s23 }
   0x5   : > { %p76_p0 = scmp.eq.s32.totalorder %s75_s27, 0  ;;  %p85_p1 = scmp.ne.s32.totalorder %s4080_s23, %s4076_s22 }
   0x6   : > { %p86_p2 = scmp.eq.s32.totalorder %s4084_s24, 0  ;;  %p91_p3 = scmp.ne.s32.totalorder %s4076_s22, %s4072_s21 }
   0x7   : > { %s4161_s29 = scalar_select %p76_p0, %s4080_s23, %s78_s28  }
   0x8   : > { %p87_p4 = por %p86_p2, %p85_p1  ;;  %p92_p5 = scmp.eq.s32.totalorder %s4148_s25, 0 }
   0x9   : > { %p3901_p6 = scmp.lt.s32.totalorder %s4084_s24, 2  ;;  %s233_s7 = sand.u32 1, %s4080_s23  }
   0xa   : > { %p4165_p7 = por %p92_p5, %p91_p3  ;;  %s3396_s8 = sshll.u32 %s233_s7, 7 }
   0xb   : > { %s3509_s9 = sshll.u32 %s4084_s24, 11  ;;  %s237_s13 = scalar_lea.vmem [#allocation2], %s3396_s8 }
   0xc   : > { %s5150_s30 = scalar_select %p4165_p7, 1, 0 }
   0xd   : > { %s4174_s12 = scalar_lea.hbm %s5144_s2, %s3509_s9  ;;  %s245_s14 = sshll.u32 %s237_s13, 4  ;;  %s4176_s14 = int_to_ptr.vmem [resolvable:$true] %s245_s14 }
   0xe   : > { %p4178_p8 = pnand %p3901_p6, %p87_p4  ;;  %s4183_s16 = scalar_lea.sflag [#allocation3], %s233_s7 }
   0xf   : > { %s4022_s17 = scalar_lea.hbm %s4174_s12, 2048  ;;  %s4027_s20 = scalar_lea.hbm %s5144_s2, 4096 }
  0x10   : > { %p4023_p10 = scmp.ne.s32.totalorder %s4174_s12, %s4022_s17  ;;  %p4024_p11 = pneg %p4178_p8 }
  0x11   : > { %p4028_p0 = scmp.lt.s32.totalorder %s4174_s12, %s5144_s2  ;;  %p4029_p1 = scmp.lt.s32.totalorder %s4027_s20, %s4022_s17 }
  0x12   : > { %p4025_p12 = pnand %p4024_p11, %p4023_p10 }
  0x13   : > { %p4030_p2 = por %p4029_p1, %p4028_p0 }
  0x14   : > { %p4026_p13 = pneg %p4025_p12 }
  0x16   : > { %p4031_p3 = pnand %p4030_p2, %p4026_p13 }
  0x18   : > { %4034 = shalt.err (!%p4031_p3)
}
  0x19   : > { %s4035_s28 = scalar_lea.vmem %s4176_s14, 2048  ;;  %s4086_s7 = smov [#allocation2]  }
  0x1a   : > { %p4036_p4 = scmp.ne.s32.totalorder %s4176_s14, %s4035_s28  ;;  %s4040_s8 = sshll.u32 %s4086_s7, 4  ;;  %s4041_s8 = int_to_ptr.vmem [resolvable:$false] %s4040_s8 }
  0x1b   : > { %s4042_s9 = scalar_lea.vmem %s4041_s8, 4096  ;;  %p4043_p10 = scmp.lt.s32.totalorder %s4176_s14, %s4041_s8 }
  0x1c   : > { %p4038_p5 = pnand %p4036_p4, %p4024_p11  ;;  %p4044_p12 = scmp.lt.s32.totalorder %s4042_s9, %s4035_s28 }
  0x1e   : > { %p4039_p6 = pneg %p4038_p5  ;;  %p4045_p9 = por %p4044_p12, %p4043_p10 }
  0x20   : > { %p4046_p7 = pnand %p4045_p9, %p4039_p6 }
  0x22   : > { %4049 = shalt.err (!%p4046_p7)
}
  0x23   : > { %s4087_s10 = smov 128   ;;  %s4088_s11 = smov 8  }
  0x24   : > { %3900 = dma.hbm_to_vmem [thread:$0]  (!%p4178_p8), %s4174_s12, 2048, %s4176_s14, %s4183_s16, %s4087_s10, %s4087_s10, %s4088_s11  }
  0x25   : > { %p253_p11 = scmp.lt.s32.totalorder %s4084_s24, 3  ;;  %p5152_p13 = scmp.ge.s32.totalorder %s4084_s24, 1 }
  0x27   : > { %p254_p0 = pnand %p5152_p13, %p253_p11 }
  0x28   : > { %s259_s13 = sand.u32 (!%p254_p0), 1, %s4076_s22   ;;  %p5153_p7 = scmp.ne.s32.totalorder (!%p254_p0), %s5150_s30, 0 }
  0x29   : > { %257 = sbr.rel (%p254_p0) target bundleno = 2430 (0x97e), region = 44  ;;  %s3401_s17 = sshll.u32 (!%p254_p0), %s259_s13, 7 }
  0x2a   : > { %s260_s18 = scalar_lea.sflag (!%p254_p0), [#allocation3], %s259_s13  ;;  %s4208_s19 = scalar_lea.vmem (!%p254_p0), [#allocation2], %s3401_s17 }
  0x2e   : > { %4067 = dma.done.wait (%p5153_p7), %s260_s18, 2048  }
  0x2f   : > { %4069 = vsyncadd (%p5153_p7), %s260_s18, 4294965248  ;;  %s3402_s20 = sshll.u32 %s4148_s25, 3  ;;  %vm366_vm0 = vcmask 64512   ;;  %v359_v0 = vld [vmem:[%s5145_s3] sm:$0xff]  ;;  %v4239_v6 = vld [vmem:[%s5146_s4 + $0x18] sm:$0xff]  ;;  %vm560_vm1 = vcmask 261120  }
  0x30   : > { %p304_p9 = scmp.lt.s32.totalorder %s3402_s20, 15  ;;  %3653 = vmatprep.subr.mxu0 %v359_v0  ;;  %v4245_v7 = vld [vmem:[%s5146_s4 + $0x10] sm:$0xff]  ;;  %3887 = vmatprep.subr.mxu1 %v4239_v6  ;;  %v4281_v19 = vld [vmem:[%s5146_s4 + $0x8] sm:$0xff]  ;;  %v4289_v20 = vld [vmem:[%s5146_s4] sm:$0xff]  ;;  %vm754_vm2 = vcmask 130048   ;;  %s4091_s16 = smov 64  }
  0x31   : > { %3654 = vmatpush3.msra.mxu0 %v359_v0  ;;  %3891 = vmatpush3.msra.mxu1 %v4239_v6  ;;  %v4299_v22 = vld [vmem:[%s5147_s5] ss:$0 sm:$0xff]  ;;  %s4092_s27 = smov 8   ;;  %vm3219_vm3 = vcmask 130112   ;;  %vm3284_vm4 = vcmask 1041409   ;;  %vm3286_vm5 = vcmask 1042434  }
  0x32   : > { %s5159_s20 = smov (!%p304_p9, %s3402_s20), 15  ;;  %3679 = vmatprep.subr.mxu0 %v4239_v6  ;;  %3888 = vmatprep.subr.mxu1 %v4245_v7  ;;  %vm3288_vm6 = vcmask 1043459   ;;  %vm3290_vm7 = vcmask 1044484   ;;  %vm3292_vm8 = vcmask 1045509   ;;  %vm3294_vm9 = vcmask 1046534   ;;  %p318_p8 = scmp.lt.s32.totalorder %s4148_s25, 1 }
  0x33   : > { %s3510_s24 = sshll.u32 %s5159_s20, 4  ;;  %3892 = vmatpush3.msra.mxu1 %v4245_v7  ;;  %s4089_s20 = smov 32   ;;  %vm3296_vm10 = vcmask 1047559   ;;  %vm3302_vm11 = vcmask 7168  }
  0x34   : > { %s4223_s15 = scalar_lea.vmem %s5142_s0, %s3510_s24  ;;  %3889 = vmatprep.subr.mxu1 %v4281_v19  ;;  %s4386_s14 = scalar_lea.vmem %s5143_s1, %s3510_s24 }
  0x35   : > { %v322_v1 = vld [vmem:[%s4223_s15] sm:$0xff]  ;;  %v323_v2 = vld [vmem:[%s4223_s15 + $0x8] sm:$0xff]  ;;  %v324_v3 = vld [vmem:[%s4223_s15 + $0x10] sm:$0xff]  ;;  %3893 = vmatpush3.msra.mxu1 %v4281_v19  ;;  %s4090_s24 = smov 96   ;;  %s5161_s25 = smov (!%p318_p8, %s4148_s25), 1 }
  0x36   : > { %3655 = vmatprep.mubr.msk.f32.mxu0 %vm366_vm0, %v322_v1  ;;  %v325_v4 = vld [vmem:[%s4223_s15 + $0x18] sm:$0xff]  ;;  %v326_v5 = vld [vmem:[%s4223_s15 + $0x20] sm:$0xff]  ;;  %v327_v8 = vld [vmem:[%s4223_s15 + $0x28] sm:$0xff]  ;;  %3890 = vmatprep.subr.mxu1 %v4289_v20 }
  0x37   : > { %3656 = vmatmul.mubr.msk.f32.vlgmr.msra.gmra.mxu0 %vm366_vm0, %v323_v2  ;;  %v328_v9 = vld [vmem:[%s4223_s15 + $0x30] sm:$0xff]  ;;  %v329_v10 = vld [vmem:[%s4223_s15 + $0x38] sm:$0xff]  ;;  %v330_v11 = vld [vmem:[%s4223_s15 + $0x40] sm:$0xff]  ;;  %3894 = vmatpush3.msra.mxu1 %v4289_v20 }
  0x38   : > { %3658 = vmatprep.mubr.msk.f32.mxu0 %vm366_vm0, %v324_v3  ;;  %3680 = vmatpush3.msra.mxu0 %v4239_v6  ;;  %v331_v12 = vld [vmem:[%s4223_s15 + $0x48] sm:$0xff]  ;;  %v332_v13 = vld [vmem:[%s4223_s15 + $0x50] sm:$0xff]  ;;  %v333_v14 = vld [vmem:[%s4223_s15 + $0x58] sm:$0xff] }
  0x39   : > { %3681 = vmatprep.subr.mxu0 %v4245_v7  ;;  %v334_v15 = vld [vmem:[%s4223_s15 + $0x60] sm:$0xff]  ;;  %v335_v16 = vld [vmem:[%s4223_s15 + $0x68] sm:$0xff]  ;;  %v336_v17 = vld [vmem:[%s4223_s15 + $0x70] sm:$0xff] }
  0x3a   : > { %3682 = vmatpush3.msra.mxu0 %v4245_v7  ;;  %v337_v18 = vld [vmem:[%s4223_s15 + $0x78] sm:$0xff]  ;;  %v4389_v54 = vld [vmem:[%s4386_s14] sm:$0xff]  ;;  %v4405_v58 = vld [vmem:[%s4386_s14 + $0x8] sm:$0xff] }
  0x3b   : > { %3659 = vmatmul.mubr.msk.f32.gmra.mxu0 %vm366_vm0, %v325_v4  ;;  %3683 = vmatprep.subr.mxu0 %v4281_v19  ;;  %v4394_v55 = vld [vmem:[%s4386_s14 + $0x20] sm:$0xff]  ;;  %v4409_v59 = vld [vmem:[%s4386_s14 + $0x10] sm:$0xff]  ;;  %v4423_v62 = vld [vmem:[%s4386_s14 + $0x18] sm:$0xff] }
  0x3c   : > { %3661 = vmatprep.mubr.msk.f32.mxu0 %vm366_vm0, %v326_v5  ;;  %3684 = vmatpush3.msra.mxu0 %v4281_v19  ;;  %v4427_v63 = vld [vmem:[%s4386_s14 + $0x30] sm:$0xff]  ;;  %v4439_v2 = vld [vmem:[%s4386_s14 + $0x28] sm:$0xff]  ;;  %v4445_v3 = vld [vmem:[%s4386_s14 + $0x40] sm:$0xff] }
  0x3d   : > { %3685 = vmatprep.subr.mxu0 %v4289_v20 }
  0x3e   : > { %3686 = vmatpush3.msra.mxu0 %v4289_v20 }
  0x3f   : > { %3662 = vmatmul.mubr.msk.f32.gmra.mxu0 %vm366_vm0, %v327_v8  ;;  %v4457_v8 = vld [vmem:[%s4386_s14 + $0x38] sm:$0xff] }
  0x40   : > { %3664 = vmatprep.mubr.msk.f32.mxu0 %vm366_vm0, %v328_v9  ;;  %v4463_v9 = vld [vmem:[%s4386_s14 + $0x50] sm:$0xff] }
  0x43   : > { %3665 = vmatmul.mubr.msk.f32.gmra.mxu0 %vm366_vm0, %v329_v10 }
  0x44   : > { %3667 = vmatprep.mubr.msk.f32.mxu0 %vm366_vm0, %v330_v11 }
  0x47   : > { %3668 = vmatmul.mubr.msk.f32.gmra.mxu0 %vm366_vm0, %v331_v12  ;;  %v4475_v12 = vld [vmem:[%s4386_s14 + $0x48] sm:$0xff] }
  0x48   : > { %3670 = vmatprep.mubr.msk.f32.mxu0 %vm366_vm0, %v332_v13  ;;  %v4481_v13 = vld [vmem:[%s4386_s14 + $0x60] sm:$0xff] }
  0x4b   : > { %3671 = vmatmul.mubr.msk.f32.gmra.mxu0 %vm366_vm0, %v333_v14 }
  0x4c   : > { %3673 = vmatprep.mubr.msk.f32.mxu0 %vm366_vm0, %v334_v15 }
  0x4f   : > { %3674 = vmatmul.mubr.msk.f32.gmra.mxu0 %vm366_vm0, %v335_v16  ;;  %v4493_v16 = vld [vmem:[%s4386_s14 + $0x58] sm:$0xff] }
  0x50   : > { %3676 = vmatprep.mubr.msk.f32.mxu0 %vm366_vm0, %v336_v17  ;;  %v4499_v17 = vld [vmem:[%s4386_s14 + $0x70] sm:$0xff] }
  0x53   : > { %3677 = vmatmul.mubr.msk.f32.gmra.mxu0 %vm366_vm0, %v337_v18 }
  0xf7   : > { %v3657_v21 = vpop.f32.mrf.mxu0 }
  0xf8   : > { %v4305_v25 = vadd.f32 %v3657_v21, %v4299_v22 }
  0xf9   : > { %v481_v23 = vpop.f32.mrf.mxu0 }
  0xfa   : > { %v4302_v24 = vadd.f32 %v4299_v22, %v481_v23  ;;  %v4511_v23 = vld [vmem:[%s4386_s14 + $0x68] sm:$0xff] }
  0xfb   : > { %v3660_v26 = vpop.f32.mrf.mxu0 }
  0xfc   : > { %3687 = vmatprep.mubr.msk.f32.mxu0 %vm560_vm1, %v4302_v24  ;;  %v4310_v27 = vadd.f32 %v3660_v26, %v4299_v22 }
  0xfd   : > { %v491_v28 = vpop.f32.mrf.mxu0  ;;  %3688 = vmatmul.mubr.msk.f32.vlgmr.msra.gmra.mxu0 %vm560_vm1, %v4305_v25 }
  0xfe   : > { %v4315_v29 = vadd.f32 %v4299_v22, %v491_v28 }
  0xff   : > { %v3663_v30 = vpop.f32.mrf.mxu0 }
 0x100   : > { %3690 = vmatprep.mubr.msk.f32.mxu0 %vm560_vm1, %v4315_v29  ;;  %v4320_v31 = vadd.f32 %v3663_v30, %v4299_v22  ;;  %v4526_v30 = vld [vmem:[%s4386_s14 + $0x78] sm:$0xff] }
 0x101   : > { %v501_v32 = vpop.f32.mrf.mxu0  ;;  %3691 = vmatmul.mubr.msk.f32.gmra.mxu0 %vm560_vm1, %v4310_v27 }
 0x102   : > { %v4325_v33 = vadd.f32 %v4299_v22, %v501_v32 }
 0x103   : > { %v3666_v34 = vpop.f32.mrf.mxu0 }
 0x104   : > { %3693 = vmatprep.mubr.msk.f32.mxu0 %vm560_vm1, %v4325_v33  ;;  %v4330_v35 = vadd.f32 %v3666_v34, %v4299_v22 }
 0x105   : > { %v511_v36 = vpop.f32.mrf.mxu0  ;;  %3694 = vmatmul.mubr.msk.f32.gmra.mxu0 %vm560_vm1, %v4320_v31 }
 0x106   : > { %v4335_v37 = vadd.f32 %v4299_v22, %v511_v36 }
 0x107   : > { %v3669_v38 = vpop.f32.mrf.mxu0 }
 0x108   : > { %3696 = vmatprep.mubr.msk.f32.mxu0 %vm560_vm1, %v4335_v37  ;;  %v4340_v39 = vadd.f32 %v3669_v38, %v4299_v22 }
 0x109   : > { %v521_v40 = vpop.f32.mrf.mxu0  ;;  %3697 = vmatmul.mubr.msk.f32.gmra.mxu0 %vm560_vm1, %v4330_v35 }
 0x10a   : > { %v4345_v41 = vadd.f32 %v4299_v22, %v521_v40  ;;  %3715 = vmatprep.mubr.msk.f32.mxu0 %vm754_vm2, %v4389_v54 }
 0x10b   : > { %v3672_v42 = vpop.f32.mrf.mxu0 }
 0x10c   : > { %3699 = vmatprep.mubr.msk.f32.mxu1 %vm560_vm1, %v4345_v41  ;;  %v4350_v43 = vadd.f32 %v3672_v42, %v4299_v22 }
 0x10d   : > { %v531_v44 = vpop.f32.mrf.mxu0  ;;  %3700 = vmatmul.mubr.msk.f32.vlgmr.msra.gmra.mxu1 %vm560_vm1, %v4340_v39 }
 0x10e   : > { %v4355_v45 = vadd.f32 %v4299_v22, %v531_v44 }
 0x10f   : > { %v3675_v46 = vpop.f32.mrf.mxu0 }
 0x110   : > { %3702 = vmatprep.mubr.msk.f32.mxu1 %vm560_vm1, %v4355_v45  ;;  %v4360_v47 = vadd.f32 %v3675_v46, %v4299_v22 }
 0x111   : > { %v541_v48 = vpop.f32.mrf.mxu0  ;;  %3703 = vmatmul.mubr.msk.f32.gmra.mxu1 %vm560_vm1, %v4350_v43 }
 0x112   : > { %v4365_v49 = vadd.f32 %v4299_v22, %v541_v48 }
 0x113   : > { %v3678_v50 = vpop.f32.mrf.mxu0 }
 0x114   : > { %3705 = vmatprep.mubr.msk.f32.mxu1 %vm560_vm1, %v4365_v49  ;;  %v4370_v51 = vadd.f32 %v3678_v50, %v4299_v22 }
 0x115   : > { %v551_v52 = vpop.f32.mrf.mxu0  ;;  %3706 = vmatmul.mubr.msk.f32.gmra.mxu1 %vm560_vm1, %v4360_v47 }
 0x116   : > { %v4375_v53 = vadd.f32 %v4299_v22, %v551_v52 }
 0x118   : > { %3708 = vmatprep.mubr.msk.f32.mxu1 %vm560_vm1, %v4375_v53 }
 0x119   : > { %3709 = vmatmul.mubr.msk.f32.gmra.mxu1 %vm560_vm1, %v4370_v51 }
 0x11a   : > { %3729 = vmatprep.mubr.msk.f32.mxu1 %vm754_vm2, %v4394_v55 }
 0x1bd   : > { %v4398_v56 = vpop.f32.mrf.mxu0 }
 0x1be   : > { %3711 = vmatprep.subr.mxu0 %v4398_v56 }
 0x1bf   : > { %v4401_v57 = vpop.f32.mrf.mxu0  ;;  %3712 = vmatpush3.msra.mxu0 %v4398_v56 }
 0x1c0   : > { %3713 = vmatprep.subr.mxu0 %v4401_v57 }
 0x1c1   : > { %v4411_v60 = vpop.f32.mrf.mxu0  ;;  %3714 = vmatpush3.msra.mxu0 %v4401_v57 }
 0x1c2   : > { %3716 = vmatmul.mubr.msk.f32.vlgmr.msra.gmra.mxu0 %vm754_vm2, %v4405_v58  ;;  %3718 = vmatprep.subr.mxu0 %v4411_v60 }
 0x1c3   : > { %v4417_v61 = vpop.f32.mrf.mxu0  ;;  %3719 = vmatpush3.msra.mxu0 %v4411_v60  ;;  %3722 = vmatprep.mubr.msk.f32.mxu0 %vm754_vm2, %v4409_v59 }
 0x1c4   : > { %3720 = vmatprep.subr.mxu0 %v4417_v61 }
 0x1c5   : > { %v4429_v0 = vpop.f32.mrf.mxu0  ;;  %3721 = vmatpush3.msra.mxu0 %v4417_v61 }
 0x1c6   : > { %3723 = vmatmul.mubr.msk.f32.vlgmr.msra.gmra.mxu0 %vm754_vm2, %v4423_v62  ;;  %3725 = vmatprep.subr.mxu1 %v4429_v0 }
 0x1c7   : > { %v4435_v1 = vpop.f32.mrf.mxu0  ;;  %3726 = vmatpush3.msra.mxu1 %v4429_v0  ;;  %3736 = vmatprep.mubr.msk.f32.mxu0 %vm754_vm2, %v4427_v63 }
 0x1c8   : > { %3727 = vmatprep.subr.mxu1 %v4435_v1 }
 0x1c9   : > { %v4447_v4 = vpop.f32.mrf.mxu0  ;;  %3728 = vmatpush3.msra.mxu1 %v4435_v1 }
 0x1ca   : > { %3730 = vmatmul.mubr.msk.f32.vlgmr.msra.gmra.mxu1 %vm754_vm2, %v4439_v2  ;;  %3732 = vmatprep.subr.mxu0 %v4447_v4 }
 0x1cb   : > { %v4453_v5 = vpop.f32.mrf.mxu0  ;;  %3733 = vmatpush3.msra.mxu0 %v4447_v4  ;;  %3743 = vmatprep.mubr.msk.f32.mxu1 %vm754_vm2, %v4445_v3 }
 0x1cc   : > { %3734 = vmatprep.subr.mxu0 %v4453_v5 }
 0x1cd   : > { %v4465_v10 = vpop.f32.mrf.mxu1  ;;  %3735 = vmatpush3.msra.mxu0 %v4453_v5 }
 0x1ce   : > { %3737 = vmatmul.mubr.msk.f32.vlgmr.msra.gmra.mxu0 %vm754_vm2, %v4457_v8  ;;  %3739 = vmatprep.subr.mxu1 %v4465_v10 }
 0x1cf   : > { %v4471_v11 = vpop.f32.mrf.mxu1  ;;  %3740 = vmatpush3.msra.mxu1 %v4465_v10  ;;  %3750 = vmatprep.mubr.msk.f32.mxu0 %vm754_vm2, %v4463_v9 }
 0x1d0   : > { %3741 = vmatprep.subr.mxu1 %v4471_v11 }
 0x1d1   : > { %v4483_v14 = vpop.f32.mrf.mxu1  ;;  %3742 = vmatpush3.msra.mxu1 %v4471_v11 }
 0x1d2   : > { %3744 = vmatmul.mubr.msk.f32.vlgmr.msra.gmra.mxu1 %vm754_vm2, %v4475_v12  ;;  %3746 = vmatprep.subr.mxu0 %v4483_v14 }
 0x1d3   : > { %v4489_v15 = vpop.f32.mrf.mxu1  ;;  %3747 = vmatpush3.msra.mxu0 %v4483_v14  ;;  %3757 = vmatprep.mubr.msk.f32.mxu1 %vm754_vm2, %v4481_v13 }
 0x1d4   : > { %3748 = vmatprep.subr.mxu0 %v4489_v15 }
 0x1d5   : > { %v4501_v18 = vpop.f32.mrf.mxu1  ;;  %3749 = vmatpush3.msra.mxu0 %v4489_v15 }
 0x1d6   : > { %3751 = vmatmul.mubr.msk.f32.vlgmr.msra.gmra.mxu0 %vm754_vm2, %v4493_v16  ;;  %3753 = vmatprep.subr.mxu1 %v4501_v18 }
 0x1d7   : > { %v4507_v21 = vpop.f32.mrf.mxu1  ;;  %3754 = vmatpush3.msra.mxu1 %v4501_v18  ;;  %3764 = vmatprep.mubr.msk.f32.mxu0 %vm754_vm2, %v4499_v17 }
 0x1d8   : > { %3755 = vmatprep.subr.mxu1 %v4507_v21 }
 0x1d9   : > { %v4516_v26 = vpop.f32.mrf.mxu1  ;;  %3756 = vmatpush3.msra.mxu1 %v4507_v21 }
 0x1da   : > { %3758 = vmatmul.mubr.msk.f32.vlgmr.msra.gmra.mxu1 %vm754_vm2, %v4511_v23  ;;  %3760 = vmatprep.subr.mxu0 %v4516_v26 }
 0x1db   : > { %v4522_v28 = vpop.f32.mrf.mxu1  ;;  %3761 = vmatpush3.msra.mxu0 %v4516_v26  ;;  %3767 = vmatprep.subr.mxu1 %v4239_v6 }
 0x1dc   : > { %3762 = vmatprep.subr.mxu0 %v4522_v28  ;;  %3768 = vmatpush3.msra.mxu1 %v4239_v6 }
 0x1dd   : > { %3763 = vmatpush3.msra.mxu0 %v4522_v28  ;;  %3769 = vmatprep.subr.mxu1 %v4245_v7 }
 0x1de   : > { %3765 = vmatmul.mubr.msk.f32.vlgmr.msra.gmra.mxu0 %vm754_vm2, %v4526_v30  ;;  %3770 = vmatpush3.msra.mxu1 %v4245_v7 }
 0x1df   : > { %3771 = vmatprep.subr.mxu1 %v4281_v19  ;;  %3803 = vmatprep.mubr.msk.f32.mxu0 %vm754_vm2, %v4389_v54 }
 0x1e0   : > { %3772 = vmatpush3.msra.mxu1 %v4281_v19 }
 0x1e1   : > { %3773 = vmatprep.subr.mxu1 %v4289_v20 }
 0x1e2   : > { %3774 = vmatpush3.msra.mxu1 %v4289_v20 }
 0x282   : > { %v3717_v32 = vpop.f32.mrf.mxu0 }
 0x284   : > { %v827_v34 = vpop.f32.mrf.mxu0 }
 0x285   : > { %1419 = vrot.lane.b32.xlu0 %v827_v34, %s4089_s20 }
 0x286   : > { %v3724_v36 = vpop.f32.mrf.mxu0 }
 0x288   : > { %v908_v38 = vpop.f32.mrf.mxu0 }
 0x289   : > { %1421 = vrot.lane.b32.xlu0 %v3717_v32, %s4089_s20  ;;  %1423 = vrot.lane.b32.xlu1 %v908_v38, %s4089_s20 }
 0x28a   : > { %v3731_v40 = vpop.f32.mrf.mxu1 }
 0x28c   : > { %v989_v42 = vpop.f32.mrf.mxu1 }
 0x28d   : > { %1427 = vrot.lane.b32.xlu0 %v989_v42, %s4089_s20  ;;  %1425 = vrot.lane.b32.xlu1 %v3724_v36, %s4089_s20 }
 0x28e   : > { %v3738_v44 = vpop.f32.mrf.mxu0 }
 0x290   : > { %v1070_v46 = vpop.f32.mrf.mxu0 }
 0x291   : > { %1429 = vrot.lane.b32.xlu1 %v3731_v40, %s4089_s20  ;;  %1431 = vrot.lane.b32.xlu0 %v1070_v46, %s4089_s20 }
 0x292   : > { %v3745_v48 = vpop.f32.mrf.mxu1 }
 0x294   : > { %v1151_v50 = vpop.f32.mrf.mxu1 }
 0x295   : > { %1433 = vrot.lane.b32.xlu1 %v3738_v44, %s4089_s20  ;;  %1435 = vrot.lane.b32.xlu0 %v1151_v50, %s4089_s20 }
 0x296   : > { %v3752_v52 = vpop.f32.mrf.mxu0 }
 0x298   : > { %v1232_v54 = vpop.f32.mrf.mxu0 }
 0x299   : > { %1437 = vrot.lane.b32.xlu1 %v3745_v48, %s4089_s20  ;;  %1439 = vrot.lane.b32.xlu0 %v1232_v54, %s4089_s20 }
 0x29a   : > { %v3759_v32 = vpop.f32.mrf.mxu1 }
 0x29c   : > { %v1313_v34 = vpop.f32.mrf.mxu1 }
 0x29d   : > { %1441 = vrot.lane.b32.xlu1 %v3752_v52, %s4089_s20  ;;  %1443 = vrot.lane.b32.xlu0 %v1313_v34, %s4089_s20 }
 0x29e   : > { %v3766_v36 = vpop.f32.mrf.mxu0 }
 0x2a0   : > { %v1394_v38 = vpop.f32.mrf.mxu0 }
 0x2a1   : > { %1445 = vrot.lane.b32.xlu1 %v3759_v32, %s4089_s20  ;;  %1447 = vrot.lane.b32.xlu0 %v1394_v38, %s4089_s20 }
 0x2a5   : > { %1449 = vrot.lane.b32.xlu1 %v3766_v36, %s4089_s20 }
 0x2f7   : > { %v1420_v40 = vpop.permute.xlu0 %1419 }
 0x2f8   : > { %v1467_v42 = vadd.f32 %v1420_v40, %v4401_v57 }
 0x2fa   : > { %v1483_v44 = vadd.f32 %v4299_v22, %v1467_v42 }
 0x2fb   : > { %v1422_v46 = vpop.permute.xlu0 %1421  ;;  %v1424_v48 = vpop.permute.xlu1 %1423 }
 0x2fc   : > { %3941 = vtanh.f32 %v1483_v44  ;;  %v1468_v50 = vadd.f32 %v4398_v56, %v1422_v46  ;;  %v1469_v52 = vadd.f32 %v1424_v48, %v4417_v61 }
 0x2fe   : > { %v1484_v54 = vadd.f32 %v4299_v22, %v1468_v50  ;;  %v1485_v32 = vadd.f32 %v4299_v22, %v1469_v52 }
 0x2ff   : > { %v1428_v34 = vpop.permute.xlu0 %1427  ;;  %v1426_v38 = vpop.permute.xlu1 %1425 }
 0x300   : > { %3943 = vtanh.f32 %v1484_v54  ;;  %v1471_v36 = vadd.f32 %v1428_v34, %v4435_v1  ;;  %v1470_v57 = vadd.f32 %v4411_v60, %v1426_v38 }
 0x301   : > { %3945 = vtanh.f32 %v1485_v32 }
 0x302   : > { %v1487_v40 = vadd.f32 %v4299_v22, %v1471_v36  ;;  %v1486_v42 = vadd.f32 %v4299_v22, %v1470_v57 }
 0x303   : > { %v1430_v44 = vpop.permute.xlu1 %1429  ;;  %v1432_v56 = vpop.permute.xlu0 %1431 }
 0x304   : > { %3947 = vtanh.f32 %v1487_v40  ;;  %v1472_v61 = vadd.f32 %v4429_v0, %v1430_v44  ;;  %v1473_v46 = vadd.f32 %v1432_v56, %v4453_v5 }
 0x305   : > { %3949 = vtanh.f32 %v1486_v42 }
 0x306   : > { %v1488_v48 = vadd.f32 %v4299_v22, %v1472_v61  ;;  %v1489_v50 = vadd.f32 %v4299_v22, %v1473_v46 }
 0x307   : > { %v1434_v1 = vpop.permute.xlu1 %1433  ;;  %v1436_v52 = vpop.permute.xlu0 %1435 }
 0x308   : > { %3951 = vtanh.f32 %v1488_v48  ;;  %v1474_v60 = vadd.f32 %v4447_v4, %v1434_v1  ;;  %v1475_v54 = vadd.f32 %v1436_v52, %v4471_v11 }
 0x309   : > { %v3942_v32 = vpop.eup %3941  ;;  %3953 = vtanh.f32 %v1489_v50 }
 0x30a   : > { %v1490_v34 = vadd.f32 %v4299_v22, %v1474_v60  ;;  %v1491_v0 = vadd.f32 %v4299_v22, %v1475_v54  ;;  %v1515_v38 = vmul.f32 0.1, %v3942_v32 }
 0x30b   : > { %v1438_v5 = vpop.permute.xlu1 %1437  ;;  %v1440_v36 = vpop.permute.xlu0 %1439 }
 0x30c   : > { %3955 = vtanh.f32 %v1490_v34  ;;  %v1476_v57 = vadd.f32 %v4465_v10, %v1438_v5  ;;  %v1477_v40 = vadd.f32 %v1440_v36, %v4489_v15  ;;  %1547 = vrot.lane.b32.xlu0 %v1515_v38, %s4090_s24 }
 0x30d   : > { %v3944_v4 = vpop.eup %3943  ;;  %3957 = vtanh.f32 %v1491_v0 }
 0x30e   : > { %v3946_v11 = vpop.eup %3945  ;;  %v1492_v42 = vadd.f32 %v4299_v22, %v1476_v57  ;;  %v1493_v44 = vadd.f32 %v4299_v22, %v1477_v40  ;;  %v1516_v56 = vmul.f32 0.1, %v3944_v4 }
 0x30f   : > { %v1442_v61 = vpop.permute.xlu1 %1441  ;;  %v1444_v46 = vpop.permute.xlu0 %1443  ;;  %v1517_v48 = vmul.f32 0.1, %v3946_v11 }
 0x310   : > { %3959 = vtanh.f32 %v1492_v42  ;;  %v1478_v50 = vadd.f32 %v4483_v14, %v1442_v61  ;;  %v1479_v10 = vadd.f32 %v1444_v46, %v4507_v21  ;;  %1549 = vrot.lane.b32.xlu1 %v1516_v56, %s4090_s24 }
 0x311   : > { %v3948_v15 = vpop.eup %3947  ;;  %3961 = vtanh.f32 %v1493_v44  ;;  %1551 = vrot.lane.b32.xlu0 %v1517_v48, %s4090_s24 }
 0x312   : > { %v3950_v1 = vpop.eup %3949  ;;  %v1494_v52 = vadd.f32 %v4299_v22, %v1478_v50  ;;  %v1495_v60 = vadd.f32 %v4299_v22, %v1479_v10  ;;  %v1519_v54 = vmul.f32 0.1, %v3948_v15 }
 0x313   : > { %v1446_v32 = vpop.permute.xlu1 %1445  ;;  %v1448_v34 = vpop.permute.xlu0 %1447  ;;  %v1518_v0 = vmul.f32 0.1, %v3950_v1 }
 0x314   : > { %3963 = vtanh.f32 %v1494_v52  ;;  %v1480_v14 = vadd.f32 %v4501_v18, %v1446_v32  ;;  %v1481_v21 = vadd.f32 %v1448_v34, %v4522_v28 }
 0x315   : > { %v3952_v38 = vpop.eup %3951  ;;  %3965 = vtanh.f32 %v1495_v60  ;;  %1553 = vrot.lane.b32.xlu1 %v1518_v0, %s4090_s24  ;;  %1555 = vrot.lane.b32.xlu0 %v1519_v54, %s4090_s24 }
 0x316   : > { %v3954_v5 = vpop.eup %3953  ;;  %v1496_v36 = vadd.f32 %v4299_v22, %v1480_v14  ;;  %v1497_v57 = vadd.f32 %v4299_v22, %v1481_v21  ;;  %v1520_v40 = vmul.f32 0.1, %v3952_v38 }
 0x317   : > { %v1450_v4 = vpop.permute.xlu1 %1449  ;;  %v1521_v11 = vmul.f32 0.1, %v3954_v5 }
 0x318   : > { %3967 = vtanh.f32 %v1496_v36  ;;  %v1482_v42 = vadd.f32 %v4516_v26, %v1450_v4 }
 0x319   : > { %v3956_v18 = vpop.eup %3955  ;;  %3969 = vtanh.f32 %v1497_v57  ;;  %1557 = vrot.lane.b32.xlu1 %v1520_v40, %s4090_s24  ;;  %1559 = vrot.lane.b32.xlu0 %v1521_v11, %s4090_s24 }
 0x31a   : > { %v3958_v28 = vpop.eup %3957  ;;  %v1498_v44 = vadd.f32 %v4299_v22, %v1482_v42  ;;  %v1522_v56 = vmul.f32 0.1, %v3956_v18 }
 0x31b   : > { %v1523_v61 = vmul.f32 0.1, %v3958_v28 }
 0x31c   : > { %3971 = vtanh.f32 %v1498_v44 }
 0x31d   : > { %v3960_v46 = vpop.eup %3959  ;;  %1561 = vrot.lane.b32.xlu1 %v1522_v56, %s4090_s24  ;;  %1563 = vrot.lane.b32.xlu0 %v1523_v61, %s4090_s24 }
 0x31e   : > { %v3962_v48 = vpop.eup %3961  ;;  %v1524_v50 = vmul.f32 0.1, %v3960_v46 }
 0x31f   : > { %v1525_v26 = vmul.f32 0.1, %v3962_v48 }
 0x321   : > { %v3964_v10 = vpop.eup %3963  ;;  %1565 = vrot.lane.b32.xlu1 %v1524_v50, %s4090_s24  ;;  %1567 = vrot.lane.b32.xlu0 %v1525_v26, %s4090_s24 }
 0x322   : > { %v3966_v15 = vpop.eup %3965  ;;  %v1526_v1 = vmul.f32 0.1, %v3964_v10 }
 0x323   : > { %v1527_v52 = vmul.f32 0.1, %v3966_v15 }
 0x325   : > { %v3968_v60 = vpop.eup %3967  ;;  %1569 = vrot.lane.b32.xlu1 %v1526_v1, %s4090_s24  ;;  %1571 = vrot.lane.b32.xlu0 %v1527_v52, %s4090_s24 }
 0x326   : > { %v3970_v54 = vpop.eup %3969  ;;  %v1528_v32 = vmul.f32 0.1, %v3968_v60 }
 0x327   : > { %v1529_v34 = vmul.f32 0.1, %v3970_v54 }
 0x329   : > { %v3972_v0 = vpop.eup %3971  ;;  %1573 = vrot.lane.b32.xlu1 %v1528_v32, %s4090_s24  ;;  %1575 = vrot.lane.b32.xlu0 %v1529_v34, %s4090_s24 }
 0x32a   : > { %v1530_v14 = vmul.f32 0.1, %v3972_v0 }
 0x32d   : > { %1577 = vrot.lane.b32.xlu1 %v1530_v14, %s4090_s24 }
 0x37e   : > { %v1548_v21 = vpop.permute.xlu0 %1547 }
 0x37f   : > { %v4607_v38 = vadd.f32 %v1548_v21, %v4302_v24 }
 0x381   : > { %3775 = vmatprep.mubr.msk.f32.mxu1 %vm560_vm1, %v4607_v38 }
 0x382   : > { %v1550_v5 = vpop.permute.xlu1 %1549 }
 0x383   : > { %v4612_v36 = vadd.f32 %v1550_v5, %v4305_v25  ;;  %v1552_v57 = vpop.permute.xlu0 %1551 }
 0x384   : > { %v4615_v40 = vadd.f32 %v1552_v57, %v4315_v29 }
 0x385   : > { %3776 = vmatmul.mubr.msk.f32.vlgmr.msra.gmra.mxu1 %vm560_vm1, %v4612_v36 }
 0x386   : > { %3778 = vmatprep.mubr.msk.f32.mxu1 %vm560_vm1, %v4615_v40 }
 0x387   : > { %v1554_v4 = vpop.permute.xlu1 %1553  ;;  %v1556_v24 = vpop.permute.xlu0 %1555 }
 0x388   : > { %v4622_v11 = vadd.f32 %v1554_v4, %v4310_v27  ;;  %v4625_v42 = vadd.f32 %v1556_v24, %v4325_v33 }
 0x38a   : > { %3779 = vmatmul.mubr.msk.f32.gmra.mxu1 %vm560_vm1, %v4622_v11 }
 0x38b   : > { %v1558_v25 = vpop.permute.xlu1 %1557  ;;  %3781 = vmatprep.mubr.msk.f32.mxu1 %vm560_vm1, %v4625_v42  ;;  %v1560_v29 = vpop.permute.xlu0 %1559 }
 0x38c   : > { %v4632_v18 = vadd.f32 %v1558_v25, %v4320_v31  ;;  %v4635_v28 = vadd.f32 %v1560_v29, %v4335_v37 }
 0x38e   : > { %3782 = vmatmul.mubr.msk.f32.gmra.mxu1 %vm560_vm1, %v4632_v18 }
 0x38f   : > { %v1562_v27 = vpop.permute.xlu1 %1561  ;;  %3784 = vmatprep.mubr.msk.f32.mxu1 %vm560_vm1, %v4635_v28  ;;  %v1564_v33 = vpop.permute.xlu0 %1563 }
 0x390   : > { %v4642_v44 = vadd.f32 %v1562_v27, %v4330_v35  ;;  %v4645_v56 = vadd.f32 %v1564_v33, %v4345_v41 }
 0x392   : > { %3785 = vmatmul.mubr.msk.f32.gmra.mxu1 %vm560_vm1, %v4642_v44 }
 0x393   : > { %v1566_v31 = vpop.permute.xlu1 %1565  ;;  %3787 = vmatprep.mubr.msk.f32.mxu1 %vm560_vm1, %v4645_v56  ;;  %v1568_v37 = vpop.permute.xlu0 %1567 }
 0x394   : > { %v4652_v61 = vadd.f32 %v1566_v31, %v4340_v39  ;;  %v4655_v46 = vadd.f32 %v1568_v37, %v4355_v45 }
 0x396   : > { %3788 = vmatmul.mubr.msk.f32.gmra.mxu1 %vm560_vm1, %v4652_v61 }
 0x397   : > { %v1570_v35 = vpop.permute.xlu1 %1569  ;;  %3790 = vmatprep.mubr.msk.f32.mxu1 %vm560_vm1, %v4655_v46  ;;  %v1572_v41 = vpop.permute.xlu0 %1571 }
 0x398   : > { %v4662_v48 = vadd.f32 %v1570_v35, %v4350_v43  ;;  %v4665_v50 = vadd.f32 %v1572_v41, %v4365_v49 }
 0x39a   : > { %3791 = vmatmul.mubr.msk.f32.gmra.mxu1 %vm560_vm1, %v4662_v48 }
 0x39b   : > { %v1574_v39 = vpop.permute.xlu1 %1573  ;;  %3793 = vmatprep.mubr.msk.f32.mxu1 %vm560_vm1, %v4665_v50  ;;  %v1576_v45 = vpop.permute.xlu0 %1575 }
 0x39c   : > { %v4672_v26 = vadd.f32 %v1574_v39, %v4360_v47  ;;  %v4675_v10 = vadd.f32 %v1576_v45, %v4375_v53 }
 0x39e   : > { %3794 = vmatmul.mubr.msk.f32.gmra.mxu1 %vm560_vm1, %v4672_v26 }
 0x39f   : > { %v1578_v43 = vpop.permute.xlu1 %1577  ;;  %3796 = vmatprep.mubr.msk.f32.mxu1 %vm560_vm1, %v4675_v10 }
 0x3a0   : > { %v4682_v49 = vadd.f32 %v1578_v43, %v4370_v51 }
 0x3a2   : > { %3797 = vmatmul.mubr.msk.f32.gmra.mxu1 %vm560_vm1, %v4682_v49 }
 0x445   : > { %v4686_v15 = vpop.f32.mrf.mxu1 }
 0x446   : > { %3799 = vmatprep.subr.mxu0 %v4686_v15 }
 0x447   : > { %v4689_v47 = vpop.f32.mrf.mxu1  ;;  %3800 = vmatpush3.msra.mxu0 %v4686_v15 }
 0x448   : > { %3801 = vmatprep.subr.mxu0 %v4689_v47 }
 0x449   : > { %3802 = vmatpush3.msra.mxu0 %v4689_v47 }
 0x44a   : > { %v4694_v53 = vpop.f32.mrf.mxu1  ;;  %3804 = vmatmul.mubr.msk.f32.vlgmr.msra.gmra.mxu0 %vm754_vm2, %v4405_v58 }
 0x44b   : > { %3806 = vmatprep.subr.mxu0 %v4694_v53  ;;  %3810 = vmatprep.mubr.msk.f32.mxu0 %vm754_vm2, %v4409_v59 }
 0x44c   : > { %v4701_v51 = vpop.f32.mrf.mxu1  ;;  %3807 = vmatpush3.msra.mxu0 %v4694_v53 }
 0x44d   : > { %3808 = vmatprep.subr.mxu0 %v4701_v51 }
 0x44e   : > { %v4705_v1 = vpop.f32.mrf.mxu1  ;;  %3809 = vmatpush3.msra.mxu0 %v4701_v51 }
 0x44f   : > { %3811 = vmatmul.mubr.msk.f32.vlgmr.msra.gmra.mxu0 %vm754_vm2, %v4423_v62  ;;  %3813 = vmatprep.subr.mxu0 %v4705_v1 }
 0x450   : > { %v4711_v58 = vpop.f32.mrf.mxu1  ;;  %3814 = vmatpush3.msra.mxu0 %v4705_v1  ;;  %3817 = vmatprep.mubr.msk.f32.mxu0 %vm754_vm2, %v4394_v55 }
 0x451   : > { %3815 = vmatprep.subr.mxu0 %v4711_v58 }
 0x452   : > { %v4717_v59 = vpop.f32.mrf.mxu1  ;;  %3816 = vmatpush3.msra.mxu0 %v4711_v58 }
 0x453   : > { %3818 = vmatmul.mubr.msk.f32.vlgmr.msra.gmra.mxu0 %vm754_vm2, %v4439_v2  ;;  %3820 = vmatprep.subr.mxu0 %v4717_v59 }
 0x454   : > { %v4723_v62 = vpop.f32.mrf.mxu1  ;;  %3821 = vmatpush3.msra.mxu0 %v4717_v59  ;;  %3824 = vmatprep.mubr.msk.f32.mxu0 %vm754_vm2, %v4427_v63 }
 0x455   : > { %3822 = vmatprep.subr.mxu0 %v4723_v62 }
 0x456   : > { %v4729_v55 = vpop.f32.mrf.mxu1  ;;  %3823 = vmatpush3.msra.mxu0 %v4723_v62 }
 0x457   : > { %3825 = vmatmul.mubr.msk.f32.vlgmr.msra.gmra.mxu0 %vm754_vm2, %v4457_v8  ;;  %3827 = vmatprep.subr.mxu0 %v4729_v55 }
 0x458   : > { %v4735_v2 = vpop.f32.mrf.mxu1  ;;  %3828 = vmatpush3.msra.mxu0 %v4729_v55  ;;  %3831 = vmatprep.mubr.msk.f32.mxu0 %vm754_vm2, %v4445_v3 }
 0x459   : > { %3829 = vmatprep.subr.mxu0 %v4735_v2 }
 0x45a   : > { %v4741_v63 = vpop.f32.mrf.mxu1  ;;  %3830 = vmatpush3.msra.mxu0 %v4735_v2 }
 0x45b   : > { %3832 = vmatmul.mubr.msk.f32.vlgmr.msra.gmra.mxu0 %vm754_vm2, %v4475_v12  ;;  %3834 = vmatprep.subr.mxu0 %v4741_v63 }
 0x45c   : > { %v4747_v8 = vpop.f32.mrf.mxu1  ;;  %3835 = vmatpush3.msra.mxu0 %v4741_v63  ;;  %3838 = vmatprep.mubr.msk.f32.mxu0 %vm754_vm2, %v4463_v9 }
 0x45d   : > { %3836 = vmatprep.subr.mxu0 %v4747_v8 }
 0x45e   : > { %v4753_v3 = vpop.f32.mrf.mxu1  ;;  %3837 = vmatpush3.msra.mxu0 %v4747_v8 }
 0x45f   : > { %3839 = vmatmul.mubr.msk.f32.vlgmr.msra.gmra.mxu0 %vm754_vm2, %v4493_v16  ;;  %3841 = vmatprep.subr.mxu0 %v4753_v3 }
 0x460   : > { %v4759_v12 = vpop.f32.mrf.mxu1  ;;  %3842 = vmatpush3.msra.mxu0 %v4753_v3  ;;  %3845 = vmatprep.mubr.msk.f32.mxu0 %vm754_vm2, %v4481_v13 }
 0x461   : > { %3843 = vmatprep.subr.mxu0 %v4759_v12 }
 0x462   : > { %v4765_v9 = vpop.f32.mrf.mxu1  ;;  %3844 = vmatpush3.msra.mxu0 %v4759_v12 }
 0x463   : > { %3846 = vmatmul.mubr.msk.f32.vlgmr.msra.gmra.mxu0 %vm754_vm2, %v4511_v23  ;;  %3848 = vmatprep.subr.mxu0 %v4765_v9 }
 0x464   : > { %v4771_v16 = vpop.f32.mrf.mxu1  ;;  %3849 = vmatpush3.msra.mxu0 %v4765_v9  ;;  %3852 = vmatprep.mubr.msk.f32.mxu0 %vm754_vm2, %v4499_v17 }
 0x465   : > { %3850 = vmatprep.subr.mxu0 %v4771_v16 }
 0x466   : > { %3851 = vmatpush3.msra.mxu0 %v4771_v16 }
 0x467   : > { %3853 = vmatmul.mubr.msk.f32.vlgmr.msra.gmra.mxu0 %vm754_vm2, %v4526_v30 }
 0x50a   : > { %v3805_v13 = vpop.f32.mrf.mxu0 }
 0x50b   : > { %2422 = vrot.lane.b32.xlu1 %v3805_v13, %s4089_s20 }
 0x50c   : > { %v1870_v23 = vpop.f32.mrf.mxu0 }
 0x50d   : > { %2420 = vrot.lane.b32.xlu0 %v1870_v23, %s4089_s20 }
 0x50f   : > { %v3812_v52 = vpop.f32.mrf.mxu0 }
 0x510   : > { %2426 = vrot.lane.b32.xlu1 %v3812_v52, %s4089_s20 }
 0x511   : > { %v1945_v60 = vpop.f32.mrf.mxu0 }
 0x512   : > { %2424 = vrot.lane.b32.xlu0 %v1945_v60, %s4089_s20 }
 0x513   : > { %v3819_v17 = vpop.f32.mrf.mxu0 }
 0x514   : > { %2430 = vrot.lane.b32.xlu1 %v3819_v17, %s4089_s20 }
 0x515   : > { %v2020_v54 = vpop.f32.mrf.mxu0 }
 0x516   : > { %2428 = vrot.lane.b32.xlu0 %v2020_v54, %s4089_s20 }
 0x517   : > { %v3826_v32 = vpop.f32.mrf.mxu0 }
 0x518   : > { %2434 = vrot.lane.b32.xlu1 %v3826_v32, %s4089_s20 }
 0x519   : > { %v2095_v30 = vpop.f32.mrf.mxu0 }
 0x51a   : > { %2432 = vrot.lane.b32.xlu0 %v2095_v30, %s4089_s20 }
 0x51b   : > { %v3833_v34 = vpop.f32.mrf.mxu0 }
 0x51c   : > { %2438 = vrot.lane.b32.xlu1 %v3833_v34, %s4089_s20 }
 0x51d   : > { %v2170_v0 = vpop.f32.mrf.mxu0 }
 0x51e   : > { %2436 = vrot.lane.b32.xlu0 %v2170_v0, %s4089_s20 }
 0x51f   : > { %v3840_v14 = vpop.f32.mrf.mxu0 }
 0x520   : > { %2442 = vrot.lane.b32.xlu1 %v3840_v14, %s4089_s20 }
 0x521   : > { %v2245_v21 = vpop.f32.mrf.mxu0 }
 0x522   : > { %2440 = vrot.lane.b32.xlu0 %v2245_v21, %s4089_s20 }
 0x523   : > { %v3847_v5 = vpop.f32.mrf.mxu0 }
 0x524   : > { %2446 = vrot.lane.b32.xlu1 %v3847_v5, %s4089_s20 }
 0x525   : > { %v2320_v57 = vpop.f32.mrf.mxu0 }
 0x526   : > { %2444 = vrot.lane.b32.xlu0 %v2320_v57, %s4089_s20 }
 0x527   : > { %v3854_v4 = vpop.f32.mrf.mxu0 }
 0x528   : > { %2450 = vrot.lane.b32.xlu1 %v3854_v4, %s4089_s20 }
 0x529   : > { %v2395_v24 = vpop.f32.mrf.mxu0 }
 0x52a   : > { %2622 = vrot.lane.b32.xlu0 %v4239_v6, %s4091_s16 }
 0x52c   : > { %2620 = vrot.lane.b32.xlu1 %v4245_v7, %s4091_s16 }
 0x52e   : > { %2618 = vrot.lane.b32.xlu0 %v4281_v19, %s4091_s16 }
 0x532   : > { %2448 = vrot.lane.b32.xlu0 %v2395_v24, %s4089_s20 }
 0x57d   : > { %v2423_v25 = vpop.permute.xlu1 %2422 }
 0x57e   : > { %v2469_v29 = vadd.f32 %v4686_v15, %v2423_v25 }
 0x57f   : > { %v2421_v27 = vpop.permute.xlu0 %2420 }
 0x580   : > { %v2485_v33 = vadd.f32 %v4299_v22, %v2469_v29  ;;  %v2468_v31 = vadd.f32 %v2421_v27, %v4689_v47 }
 0x582   : > { %3973 = vtanh.f32 %v2485_v33  ;;  %v2484_v6 = vadd.f32 %v4299_v22, %v2468_v31  ;;  %v2427_v37 = vpop.permute.xlu1 %2426 }
 0x583   : > { %v2471_v7 = vadd.f32 %v4694_v53, %v2427_v37 }
 0x584   : > { %3975 = vtanh.f32 %v2484_v6  ;;  %v2425_v35 = vpop.permute.xlu0 %2424 }
 0x585   : > { %v2470_v19 = vadd.f32 %v2425_v35, %v4701_v51  ;;  %v2487_v41 = vadd.f32 %v4299_v22, %v2471_v7 }
 0x586   : > { %v2431_v39 = vpop.permute.xlu1 %2430 }
 0x587   : > { %v2486_v45 = vadd.f32 %v4299_v22, %v2470_v19  ;;  %v2473_v43 = vadd.f32 %v4705_v1, %v2431_v39 }
 0x588   : > { %v2429_v15 = vpop.permute.xlu0 %2428 }
 0x589   : > { %3977 = vtanh.f32 %v2486_v45  ;;  %v2472_v47 = vadd.f32 %v2429_v15, %v4711_v58  ;;  %v2489_v13 = vadd.f32 %v4299_v22, %v2473_v43 }
 0x58a   : > { %3979 = vtanh.f32 %v2487_v41  ;;  %v2435_v23 = vpop.permute.xlu1 %2434 }
 0x58b   : > { %v2488_v53 = vadd.f32 %v4299_v22, %v2472_v47  ;;  %v2475_v52 = vadd.f32 %v4717_v59, %v2435_v23 }
 0x58c   : > { %v2433_v51 = vpop.permute.xlu0 %2432 }
 0x58d   : > { %3981 = vtanh.f32 %v2488_v53  ;;  %v2474_v60 = vadd.f32 %v2433_v51, %v4723_v62  ;;  %v2491_v17 = vadd.f32 %v4299_v22, %v2475_v52 }
 0x58e   : > { %3983 = vtanh.f32 %v2489_v13  ;;  %v2439_v1 = vpop.permute.xlu1 %2438 }
 0x58f   : > { %v3974_v54 = vpop.eup %3973  ;;  %v2490_v32 = vadd.f32 %v4299_v22, %v2474_v60  ;;  %v2477_v58 = vadd.f32 %v4729_v55, %v2439_v1 }
 0x590   : > { %v2437_v30 = vpop.permute.xlu0 %2436  ;;  %v2517_v34 = vmul.f32 0.1, %v3974_v54 }
 0x591   : > { %v3976_v0 = vpop.eup %3975  ;;  %3985 = vtanh.f32 %v2490_v32  ;;  %v2476_v14 = vadd.f32 %v2437_v30, %v4735_v2  ;;  %v2493_v59 = vadd.f32 %v4299_v22, %v2477_v58 }
 0x592   : > { %3987 = vtanh.f32 %v2491_v17  ;;  %v2443_v21 = vpop.permute.xlu1 %2442  ;;  %2550 = vrot.lane.b32.xlu0 %v2517_v34, %s4090_s24  ;;  %v2516_v62 = vmul.f32 0.1, %v3976_v0 }
 0x593   : > { %v2492_v5 = vadd.f32 %v4299_v22, %v2476_v14  ;;  %v2479_v57 = vadd.f32 %v4741_v63, %v2443_v21  ;;  %v4005_v14 = vld [vmem:[%s5147_s5] ss:$0 sm:$0xff]  ;;  %v2857_v21 = vld [vmem:[%s4208_s19 + $0x8] sm:$0xff] }
 0x594   : > { %v2441_v4 = vpop.permute.xlu0 %2440  ;;  %2548 = vrot.lane.b32.xlu1 %v2516_v62, %s4090_s24  ;;  %v2859_v62 = vld [vmem:[%s4208_s19 + $0x18] sm:$0xff] }
 0x595   : > { %3989 = vtanh.f32 %v2492_v5  ;;  %v2478_v55 = vadd.f32 %v2441_v4, %v4747_v8  ;;  %v2495_v2 = vadd.f32 %v4299_v22, %v2479_v57  ;;  %v2861_v57 = vld [vmem:[%s4208_s19 + $0x28] sm:$0xff] }
 0x596   : > { %v3978_v24 = vpop.eup %3977  ;;  %3991 = vtanh.f32 %v2493_v59  ;;  %v2447_v25 = vpop.permute.xlu1 %2446 }
 0x597   : > { %v3980_v29 = vpop.eup %3979  ;;  %v2494_v27 = vadd.f32 %v4299_v22, %v2478_v55  ;;  %v2481_v33 = vadd.f32 %v4753_v3, %v2447_v25  ;;  %v2518_v31 = vmul.f32 0.1, %v3978_v24  ;;  %v2863_v55 = vld [vmem:[%s4208_s19 + $0x38] sm:$0xff] }
 0x598   : > { %v2445_v6 = vpop.permute.xlu0 %2444  ;;  %2616 = vrot.lane.b32.xlu1 %v4289_v20, %s4091_s16  ;;  %v2519_v35 = vmul.f32 0.1, %v3980_v29  ;;  %v2867_v25 = vld [vmem:[%s4208_s19 + $0x58] sm:$0xff]  ;;  %v2869_v29 = vld [vmem:[%s4208_s19 + $0x68] sm:$0xff] }
 0x599   : > { %3993 = vtanh.f32 %v2494_v27  ;;  %v2480_v63 = vadd.f32 %v2445_v6, %v4759_v12  ;;  %2552 = vrot.lane.b32.xlu0 %v2518_v31, %s4090_s24  ;;  %v2497_v37 = vadd.f32 %v4299_v22, %v2481_v33  ;;  %v2856_v27 = vld [vmem:[%s4208_s19] sm:$0xff]  ;;  %v2871_v33 = vld [vmem:[%s4208_s19 + $0x78] sm:$0xff] }
 0x59a   : > { %v3982_v8 = vpop.eup %3981  ;;  %3995 = vtanh.f32 %v2495_v2  ;;  %v2451_v7 = vpop.permute.xlu1 %2450  ;;  %v2865_v2 = vld [vmem:[%s4208_s19 + $0x48] sm:$0xff]  ;;  %v2860_v6 = vld [vmem:[%s4208_s19 + $0x20] sm:$0xff] }
 0x59b   : > { %v3984_v19 = vpop.eup %3983  ;;  %v2496_v41 = vadd.f32 %v4299_v22, %v2480_v63  ;;  %v2483_v3 = vadd.f32 %v4765_v9, %v2451_v7  ;;  %v2520_v39 = vmul.f32 0.1, %v3982_v8  ;;  %v2862_v8 = vld [vmem:[%s4208_s19 + $0x30] sm:$0xff] }
 0x59c   : > { %v2623_v45 = vpop.permute.xlu0 %2622  ;;  %2554 = vrot.lane.b32.xlu1 %v2519_v35, %s4090_s24  ;;  %v2521_v43 = vmul.f32 0.1, %v3984_v19  ;;  %v2866_v7 = vld [vmem:[%s4208_s19 + $0x50] sm:$0xff]  ;;  %v2868_v35 = vld [vmem:[%s4208_s19 + $0x60] sm:$0xff] }
 0x59d   : > { %3997 = vtanh.f32 %v2496_v41  ;;  %2556 = vrot.lane.b32.xlu0 %v2520_v39, %s4090_s24  ;;  %3855 = vmatprep.subr.mxu1 %v2623_v45  ;;  %v2499_v12 = vadd.f32 %v4299_v22, %v2483_v3  ;;  %v2870_v19 = vld [vmem:[%s4208_s19 + $0x70] sm:$0xff] }
 0x59e   : > { %v3986_v20 = vpop.eup %3985  ;;  %3999 = vtanh.f32 %v2497_v37  ;;  %3856 = vmatpush3.msra.mxu1 %v2623_v45  ;;  %v2621_v15 = vpop.permute.xlu1 %2620  ;;  %v2864_v37 = vld [vmem:[%s4208_s19 + $0x40] sm:$0xff] }
 0x59f   : > { %v3988_v47 = vpop.eup %3987  ;;  %v2522_v13 = vmul.f32 0.1, %v3986_v20  ;;  %3857 = vmatprep.subr.mxu1 %v2621_v15  ;;  %4001 = vtanh.f32 %v2499_v12 }
 0x5a0   : > { %v2619_v23 = vpop.permute.xlu0 %2618  ;;  %2558 = vrot.lane.b32.xlu1 %v2521_v43, %s4090_s24  ;;  %3858 = vmatpush3.msra.mxu1 %v2621_v15  ;;  %v2523_v53 = vmul.f32 0.1, %v3988_v47 }
 0x5a1   : > { %2560 = vrot.lane.b32.xlu0 %v2522_v13, %s4090_s24  ;;  %3859 = vmatprep.subr.mxu1 %v2619_v23 }
 0x5a2   : > { %v3990_v9 = vpop.eup %3989  ;;  %3860 = vmatpush3.msra.mxu1 %v2619_v23 }
 0x5a3   : > { %v3992_v52 = vpop.eup %3991  ;;  %v2524_v51 = vmul.f32 0.1, %v3990_v9 }
 0x5a4   : > { %2562 = vrot.lane.b32.xlu1 %v2523_v53, %s4090_s24  ;;  %v2525_v60 = vmul.f32 0.1, %v3992_v52  ;;  %v2449_v5 = vpop.permute.xlu0 %2448 }
 0x5a5   : > { %2564 = vrot.lane.b32.xlu0 %v2524_v51, %s4090_s24  ;;  %v2482_v4 = vadd.f32 %v2449_v5, %v4771_v16  ;;  %v2858_v16 = vld [vmem:[%s4208_s19 + $0x10] sm:$0xff]  ;;  %s4093_s19 = smov 120  }
 0x5a6   : > { %v3994_v22 = vpop.eup %3993 }
 0x5a7   : > { %v3996_v17 = vpop.eup %3995  ;;  %v2526_v1 = vmul.f32 0.1, %v3994_v22  ;;  %v2498_v24 = vadd.f32 %v4005_v14, %v2482_v4 }
 0x5a8   : > { %2566 = vrot.lane.b32.xlu1 %v2525_v60, %s4090_s24  ;;  %v2527_v32 = vmul.f32 0.1, %v3996_v17 }
 0x5a9   : > { %2568 = vrot.lane.b32.xlu0 %v2526_v1, %s4090_s24  ;;  %4003 = vtanh.f32 %v2498_v24 }
 0x5aa   : > { %v3998_v54 = vpop.eup %3997 }
 0x5ab   : > { %v4000_v58 = vpop.eup %3999  ;;  %v2528_v30 = vmul.f32 0.1, %v3998_v54 }
 0x5ac   : > { %2570 = vrot.lane.b32.xlu1 %v2527_v32, %s4090_s24  ;;  %v2529_v34 = vmul.f32 0.1, %v4000_v58  ;;  %v4002_v0 = vpop.eup %4001 }
 0x5ad   : > { %2572 = vrot.lane.b32.xlu0 %v2528_v30, %s4090_s24  ;;  %v2531_v59 = vmul.f32 0.1, %v4002_v0 }
 0x5b0   : > { %2574 = vrot.lane.b32.xlu1 %v2529_v34, %s4090_s24 }
 0x5b1   : > { %2628 = vrot.lane.b32.xlu0 %v4005_v14, %s4091_s16 }
 0x5b4   : > { %2578 = vrot.lane.b32.xlu1 %v2531_v59, %s4090_s24 }
 0x5b5   : > { %2890 = vrot.lane.b32.xlu0 %v2857_v21, %s4092_s27 }
 0x5b6   : > { %v4004_v31 = vpop.eup %4003 }
 0x5b7   : > { %v2530_v63 = vmul.f32 0.1, %v4004_v31 }
 0x5b8   : > { %2888 = vrot.lane.b32.xlu1 %v2856_v27, %s4092_s27 }
 0x5b9   : > { %2894 = vrot.lane.b32.xlu0 %v2859_v62, %s4092_s27 }
 0x5bc   : > { %2892 = vrot.lane.b32.xlu1 %v2858_v16, %s4092_s27  ;;  %v4006_v16 = vld [vmem:[%s4223_s15 + $0x8] sm:$0xff] }
 0x5bd   : > { %2898 = vrot.lane.b32.xlu0 %v2861_v57, %s4092_s27 }
 0x5c0   : > { %2896 = vrot.lane.b32.xlu1 %v2860_v6, %s4092_s27 }
 0x5c1   : > { %2902 = vrot.lane.b32.xlu0 %v2863_v55, %s4092_s27 }
 0x5c4   : > { %2900 = vrot.lane.b32.xlu1 %v2862_v8, %s4092_s27  ;;  %v4007_v8 = vld [vmem:[%s4223_s15] sm:$0xff] }
 0x5c5   : > { %2906 = vrot.lane.b32.xlu0 %v2865_v2, %s4092_s27 }
 0x5c8   : > { %2904 = vrot.lane.b32.xlu1 %v2864_v37, %s4092_s27 }
 0x5c9   : > { %2910 = vrot.lane.b32.xlu0 %v2867_v25, %s4092_s27 }
 0x5cc   : > { %2908 = vrot.lane.b32.xlu1 %v2866_v7, %s4092_s27 }
 0x5cd   : > { %2914 = vrot.lane.b32.xlu0 %v2869_v29, %s4092_s27 }
 0x5d0   : > { %2912 = vrot.lane.b32.xlu1 %v2868_v35, %s4092_s27 }
 0x5d1   : > { %2918 = vrot.lane.b32.xlu0 %v2871_v33, %s4092_s27 }
 0x5d4   : > { %2916 = vrot.lane.b32.xlu1 %v2870_v19, %s4092_s27  ;;  %v4008_v19 = vld [vmem:[%s4223_s15 + $0x18] sm:$0xff] }
 0x5d5   : > { %2576 = vrot.lane.b32.xlu0 %v2530_v63, %s4090_s24 }
 0x604   : > { %v2551_v3 = vpop.permute.xlu0 %2550 }
 0x605   : > { %v2597_v20 = vadd.f32 %v2551_v3, %v4612_v36 }
 0x606   : > { %v2549_v41 = vpop.permute.xlu1 %2548 }
 0x607   : > { %v2596_v39 = vadd.f32 %v2549_v41, %v4607_v38 }
 0x609   : > { %3863 = vmatprep.mubr.msk.f32.mxu1 %vm560_vm1, %v2596_v39 }
 0x60a   : > { %v2617_v45 = vpop.permute.xlu1 %2616 }
 0x60b   : > { %v2553_v12 = vpop.permute.xlu0 %2552  ;;  %3861 = vmatprep.subr.mxu1 %v2617_v45 }
 0x60c   : > { %v2598_v43 = vadd.f32 %v2553_v12, %v4615_v40  ;;  %3862 = vmatpush3.msra.mxu1 %v2617_v45 }
 0x60d   : > { %3864 = vmatmul.mubr.msk.f32.vlgmr.msra.gmra.mxu1 %vm560_vm1, %v2597_v20 }
 0x60e   : > { %v2555_v15 = vpop.permute.xlu1 %2554  ;;  %3866 = vmatprep.mubr.msk.f32.mxu1 %vm560_vm1, %v2598_v43 }
 0x60f   : > { %v2599_v47 = vadd.f32 %v2555_v15, %v4622_v11  ;;  %v2557_v13 = vpop.permute.xlu0 %2556 }
 0x610   : > { %v2600_v38 = vadd.f32 %v2557_v13, %v4625_v42 }
 0x611   : > { %3867 = vmatmul.mubr.msk.f32.gmra.mxu1 %vm560_vm1, %v2599_v47 }
 0x612   : > { %v2559_v23 = vpop.permute.xlu1 %2558  ;;  %3869 = vmatprep.mubr.msk.f32.mxu1 %vm560_vm1, %v2600_v38 }
 0x613   : > { %v2601_v36 = vadd.f32 %v2559_v23, %v4632_v18  ;;  %v2561_v9 = vpop.permute.xlu0 %2560 }
 0x614   : > { %v2602_v40 = vadd.f32 %v2561_v9, %v4635_v28  ;;  %v4009_v9 = vld [vmem:[%s4223_s15 + $0x10] sm:$0xff] }
 0x615   : > { %3870 = vmatmul.mubr.msk.f32.gmra.mxu1 %vm560_vm1, %v2601_v36 }
 0x616   : > { %v2563_v53 = vpop.permute.xlu1 %2562  ;;  %3872 = vmatprep.mubr.msk.f32.mxu1 %vm560_vm1, %v2602_v40 }
 0x617   : > { %v2603_v11 = vadd.f32 %v2563_v53, %v4642_v44  ;;  %v2565_v52 = vpop.permute.xlu0 %2564 }
 0x618   : > { %v2604_v42 = vadd.f32 %v2565_v52, %v4645_v56 }
 0x619   : > { %3873 = vmatmul.mubr.msk.f32.gmra.mxu1 %vm560_vm1, %v2603_v11 }
 0x61a   : > { %v2567_v51 = vpop.permute.xlu1 %2566  ;;  %3875 = vmatprep.mubr.msk.f32.mxu1 %vm560_vm1, %v2604_v42 }
 0x61b   : > { %v2605_v18 = vadd.f32 %v2567_v51, %v4652_v61  ;;  %v2569_v22 = vpop.permute.xlu0 %2568  ;;  %v4010_v51 = vld [vmem:[%s4223_s15 + $0x28] sm:$0xff] }
 0x61c   : > { %v2606_v28 = vadd.f32 %v2569_v22, %v4655_v46 }
 0x61d   : > { %3876 = vmatmul.mubr.msk.f32.gmra.mxu1 %vm560_vm1, %v2605_v18 }
 0x61e   : > { %v2571_v60 = vpop.permute.xlu1 %2570  ;;  %3878 = vmatprep.mubr.msk.f32.mxu1 %vm560_vm1, %v2606_v28 }
 0x61f   : > { %v2607_v44 = vadd.f32 %v2571_v60, %v4662_v48  ;;  %v2573_v17 = vpop.permute.xlu0 %2572 }
 0x620   : > { %v2608_v56 = vadd.f32 %v2573_v17, %v4665_v50 }
 0x621   : > { %3879 = vmatmul.mubr.msk.f32.gmra.mxu1 %vm560_vm1, %v2607_v44 }
 0x622   : > { %v2575_v1 = vpop.permute.xlu1 %2574  ;;  %3881 = vmatprep.mubr.msk.f32.mxu1 %vm560_vm1, %v2608_v56 }
 0x623   : > { %v2609_v61 = vadd.f32 %v2575_v1, %v4672_v26  ;;  %v4914_v54 = vpop.permute.xlu0 %2628 }
 0x625   : > { %3882 = vmatmul.mubr.msk.f32.gmra.mxu1 %vm560_vm1, %v2609_v61 }
 0x626   : > { %v2579_v14 = vpop.permute.xlu1 %2578 }
 0x627   : > { %v2891_v46 = vpop.permute.xlu0 %2890  ;;  %v2611_v21 = vadd.f32 %v2579_v14, %v4682_v49 }
 0x62a   : > { %v2889_v24 = vpop.permute.xlu1 %2888 }
 0x62b   : > { %v2895_v32 = vpop.permute.xlu0 %2894 }
 0x62e   : > { %v2893_v47 = vpop.permute.xlu1 %2892 }
 0x62f   : > { %v4917_v58 = vpop.permute.xlu0 %2898 }
 0x632   : > { %v2897_v1 = vpop.permute.xlu1 %2896 }
 0x633   : > { %v4919_v30 = vpop.permute.xlu0 %2902 }
 0x637   : > { %v4921_v48 = vpop.permute.xlu0 %2906 }
 0x63b   : > { %v4923_v50 = vpop.permute.xlu0 %2910 }
 0x63f   : > { %v4925_v34 = vpop.permute.xlu0 %2914 }
 0x643   : > { %v4927_v0 = vpop.permute.xlu0 %2918 }
 0x647   : > { %v2577_v26 = vpop.permute.xlu0 %2576 }
 0x648   : > { %v2610_v59 = vadd.f32 %v2577_v26, %v4675_v10  ;;  %v4011_v26 = vld [vmem:[%s4223_s15 + $0x20] sm:$0xff] }
 0x64a   : > { %3884 = vmatprep.mubr.msk.f32.mxu1 %vm560_vm1, %v2610_v59 }
 0x64b   : > { %3885 = vmatmul.mubr.msk.f32.gmra.mxu1 %vm560_vm1, %v2611_v21 }
 0x6cd   : > { %v3865_v62 = vpop.f32.mrf.mxu1 }
 0x6ce   : > { %v2751_v5 = vadd.f32 %v3865_v62, %v4914_v54 }
 0x6cf   : > { %v2745_v57 = vpop.f32.mrf.mxu1 }
 0x6d0   : > { %v2825_v4 = vmax.f32 %v2751_v5, 0.0  ;;  %v2746_v55 = vadd.f32 %v2745_v57, %v4914_v54 }
 0x6d1   : > { %v3868_v27 = vpop.f32.mrf.mxu1 }
 0x6d2   : > { %v2937_v2 = vsub.f32 %v2825_v4, %v2891_v46  ;;  %v2824_v25 = vmax.f32 %v2746_v55, 0.0  ;;  %v2841_v33 = vsub.f32 %v2825_v4, %v4006_v16  ;;  %v2761_v31 = vadd.f32 %v3868_v27, %v4914_v54  ;;  %v4012_v55 = vld [vmem:[%s4223_s15 + $0x38] sm:$0xff] }
 0x6d3   : > { %v2755_v20 = vpop.f32.mrf.mxu1 }
 0x6d4   : > { %v3033_v29 = vmul.f32 %v2937_v2, %v2937_v2  ;;  %v2936_v10 = vsub.f32 %v2824_v25, %v2889_v24  ;;  %v2953_v6 = vmul.f32 %v2841_v33, %v2841_v33  ;;  %v2827_v63 = vmax.f32 %v2761_v31, 0.0 }
 0x6d5   : > { %v2840_v37 = vsub.f32 %v2824_v25, %v4007_v8  ;;  %v2756_v12 = vadd.f32 %v2755_v20, %v4914_v54  ;;  %v3871_v36 = vpop.f32.mrf.mxu1 }
 0x6d6   : > { %v3032_v49 = vmul.f32 %v2936_v10, %v2936_v10  ;;  %3066 = vrot.lane.b32.xlu0 %v3033_v29, %s4093_s19  ;;  %v2971_v7 = vsel %vm366_vm0, %v2953_v6, 0.0  ;;  %v2843_v41 = vsub.f32 %v2827_v63, %v4008_v19  ;;  %v2939_v43 = vsub.f32 %v2827_v63, %v2895_v32 }
 0x6d7   : > { %v2952_v35 = vmul.f32 %v2840_v37, %v2840_v37  ;;  %v2826_v15 = vmax.f32 %v2756_v12, 0.0  ;;  %v2771_v53 = vadd.f32 %v3871_v36, %v4914_v54  ;;  %v2765_v60 = vpop.f32.mrf.mxu1 }
 0x6d8   : > { %3064 = vrot.lane.b32.xlu1 %v3032_v49, %s4093_s19  ;;  %v2955_v39 = vmul.f32 %v2843_v41, %v2843_v41  ;;  %v3035_v13 = vmul.f32 %v2939_v43, %v2939_v43  ;;  %v2766_v44 = vadd.f32 %v2765_v60, %v4914_v54  ;;  %v2901_v49 = vpop.permute.xlu1 %2900 }
 0x6d9   : > { %v2968_v3 = vsel %vm366_vm0, %v2952_v35, 0.0  ;;  %v2938_v38 = vsub.f32 %v2826_v15, %v2893_v47  ;;  %v2842_v40 = vsub.f32 %v2826_v15, %v4009_v9  ;;  %v2829_v52 = vmax.f32 %v2771_v53, 0.0  ;;  %v3874_v14 = vpop.f32.mrf.mxu1 }
 0x6da   : > { %v2977_v45 = vsel %vm366_vm0, %v2955_v39, 0.0  ;;  %v2828_v56 = vmax.f32 %v2766_v44, 0.0  ;;  %v2781_v21 = vadd.f32 %v3874_v14, %v4914_v54 }
 0x6db   : > { %v3034_v23 = vmul.f32 %v2938_v38, %v2938_v38  ;;  %v2954_v11 = vmul.f32 %v2842_v40, %v2842_v40  ;;  %v2845_v18 = vsub.f32 %v2829_v52, %v4010_v51  ;;  %v2941_v17 = vsub.f32 %v2829_v52, %v4917_v58  ;;  %v2775_v5 = vpop.f32.mrf.mxu1  ;;  %v4013_v51 = vld [vmem:[%s4223_s15 + $0x30] sm:$0xff] }
 0x6dc   : > { %v2940_v46 = vsub.f32 %v2828_v56, %v2897_v1  ;;  %v2844_v59 = vsub.f32 %v2828_v56, %v4011_v26  ;;  %v2831_v57 = vmax.f32 %v2781_v21, 0.0  ;;  %v2776_v16 = vadd.f32 %v2775_v5, %v4914_v54  ;;  %v2905_v8 = vpop.permute.xlu1 %2904  ;;  %v4014_v1 = vld [vmem:[%s4223_s15 + $0x48] sm:$0xff] }
 0x6dd   : > { %v2974_v42 = vsel %vm366_vm0, %v2954_v11, 0.0  ;;  %v2957_v22 = vmul.f32 %v2845_v18, %v2845_v18  ;;  %v3037_v61 = vmul.f32 %v2941_v17, %v2941_v17  ;;  %v3877_v4 = vpop.f32.mrf.mxu1 }
 0x6de   : > { %v3036_v32 = vmul.f32 %v2940_v46, %v2940_v46  ;;  %v2956_v62 = vmul.f32 %v2844_v59, %v2844_v59  ;;  %v2847_v24 = vsub.f32 %v2831_v57, %v4012_v55  ;;  %v2943_v33 = vsub.f32 %v2831_v57, %v4919_v30  ;;  %v4015_v59 = vld [vmem:[%s4223_s15 + $0x58] sm:$0xff] }
 0x6df   : > { %v2983_v28 = vsel %vm366_vm0, %v2957_v22, 0.0  ;;  %v2785_v2 = vpop.f32.mrf.mxu1  ;;  %v2830_v6 = vmax.f32 %v2776_v16, 0.0  ;;  %v2791_v60 = vadd.f32 %v3877_v4, %v4914_v54 }
 0x6e0   : > { %v2980_v58 = vsel %vm366_vm0, %v2956_v62, 0.0  ;;  %v2959_v25 = vmul.f32 %v2847_v24, %v2847_v24  ;;  %v4964_v63 = vadd.f32 %v2785_v2, %v4914_v54  ;;  %v3039_v37 = vmul.f32 %v2943_v33, %v2943_v33  ;;  %v2909_v39 = vpop.permute.xlu1 %2908 }
 0x6e1   : > { %v3880_v29 = vpop.f32.mrf.mxu1  ;;  %v2942_v35 = vsub.f32 %v2830_v6, %v2901_v49  ;;  %v2846_v18 = vsub.f32 %v2830_v6, %v4013_v51  ;;  %v2833_v44 = vmax.f32 %v2791_v60, 0.0  ;;  %v4020_v51 = vld [vmem:[%s4223_s15 + $0x60] sm:$0xff]  ;;  %v4021_v60 = vld [vmem:[%s4223_s15 + $0x70] sm:$0xff] }
 0x6e2   : > { %v2989_v10 = vsel %vm366_vm0, %v2959_v25, 0.0  ;;  %v2832_v19 = vmax.f32 %v4964_v63, 0.0  ;;  %v2801_v17 = vadd.f32 %v3880_v29, %v4914_v54  ;;  %v4017_v25 = vld [vmem:[%s4223_s15 + $0x78] sm:$0xff] }
 0x6e3   : > { %v2795_v27 = vpop.f32.mrf.mxu1  ;;  %v2958_v22 = vmul.f32 %v2846_v18, %v2846_v18  ;;  %v2945_v56 = vsub.f32 %v2833_v44, %v4921_v48 }
 0x6e4   : > { %v4968_v41 = vadd.f32 %v2795_v27, %v4914_v54  ;;  %v2944_v30 = vsub.f32 %v2832_v19, %v2905_v8  ;;  %v2835_v46 = vmax.f32 %v2801_v17, 0.0  ;;  %v4018_v8 = vld [vmem:[%s4223_s15 + $0x40] sm:$0xff] }
 0x6e5   : > { %v3883_v31 = vpop.f32.mrf.mxu1  ;;  %v3041_v14 = vmul.f32 %v2945_v56, %v2945_v56 }
 0x6e6   : > { %v2834_v20 = vmax.f32 %v4968_v41, 0.0  ;;  %v3040_v15 = vmul.f32 %v2944_v30, %v2944_v30  ;;  %v2851_v21 = vsub.f32 %v2835_v46, %v4015_v59  ;;  %v2947_v30 = vsub.f32 %v2835_v46, %v4923_v50 }
 0x6e8   : > { %v2946_v47 = vsub.f32 %v2834_v20, %v2909_v39  ;;  %v2963_v57 = vmul.f32 %v2851_v21, %v2851_v21 }
 0x6ea   : > { %v3042_v36 = vmul.f32 %v2946_v47, %v2946_v47 }
 0x6f5   : > { %2972 = vadd.xlane.f32.xlu0 %v2971_v7  ;;  %v2805_v7 = vpop.f32.mrf.mxu1 }
 0x6f6   : > { %v4975_v12 = vadd.f32 %v2805_v7, %v4914_v54 }
 0x6fc   : > { %2969 = vadd.xlane.f32.xlu1 %v2968_v3 }
 0x700   : > { %2978 = vadd.xlane.f32.xlu1 %v2977_v45  ;;  %v3038_v45 = vmul.f32 %v2942_v35, %v2942_v35 }
 0x70b   : > { %3070 = vrot.lane.b32.xlu0 %v3035_v13, %s4093_s19  ;;  %v3886_v3 = vpop.f32.mrf.mxu1  ;;  %v2836_v13 = vmax.f32 %v4975_v12, 0.0 }
 0x70c   : > { %v2821_v5 = vadd.f32 %v3886_v3, %v4914_v54 }
 0x70d   : > { %v2815_v43 = vpop.f32.mrf.mxu1  ;;  %v2852_v18 = vsub.f32 %v2836_v13, %v4020_v51 }
 0x70e   : > { %v4982_v38 = vadd.f32 %v2815_v43, %v4914_v54  ;;  %v2839_v55 = vmax.f32 %v2821_v5, 0.0  ;;  %v3043_v43 = vmul.f32 %v2947_v30, %v2947_v30 }
 0x710   : > { %v2838_v40 = vmax.f32 %v4982_v38, 0.0  ;;  %v2855_v29 = vsub.f32 %v2839_v55, %v4017_v25 }
 0x711   : > { %3068 = vrot.lane.b32.xlu1 %v3034_v23, %s4093_s19  ;;  %v2913_v23 = vpop.permute.xlu1 %2912 }
 0x712   : > { %v2948_v9 = vsub.f32 %v2836_v13, %v2913_v23 }
 0x714   : > { %v3044_v11 = vmul.f32 %v2948_v9, %v2948_v9 }
 0x715   : > { %v2917_v53 = vpop.permute.xlu1 %2916 }
 0x716   : > { %v2950_v52 = vsub.f32 %v2838_v40, %v2917_v53 }
 0x72a   : > { %2975 = vadd.xlane.f32.xlu0 %v2974_v42  ;;  %v3046_v42 = vmul.f32 %v2950_v52, %v2950_v52 }
 0x735   : > { %2984 = vadd.xlane.f32.xlu1 %v2983_v28  ;;  %v2986_v28 = vsel %vm366_vm0, %v2958_v22, 0.0 }
 0x740   : > { %3074 = vrot.lane.b32.xlu0 %v3037_v61, %s4093_s19  ;;  %v2849_v61 = vsub.f32 %v2833_v44, %v4014_v1  ;;  %v2854_v44 = vsub.f32 %v2838_v40, %v4021_v60 }
 0x742   : > { %v2961_v26 = vmul.f32 %v2849_v61, %v2849_v61  ;;  %v2966_v1 = vmul.f32 %v2854_v44, %v2854_v44 }
 0x744   : > { %v2995_v48 = vsel %vm366_vm0, %v2961_v26, 0.0  ;;  %v3010_v12 = vsel %vm366_vm0, %v2966_v1, 0.0 }
 0x746   : > { %3072 = vrot.lane.b32.xlu1 %v3036_v32, %s4093_s19  ;;  %v2811_v32 = vadd.f32 %v3883_v31, %v4914_v54  ;;  %v2967_v54 = vmul.f32 %v2855_v29, %v2855_v29 }
 0x748   : > { %v2837_v62 = vmax.f32 %v2811_v32, 0.0  ;;  %v3067_v24 = vpop.permute.xlu0 %3066  ;;  %v3013_v33 = vsel %vm366_vm0, %v2967_v54, 0.0 }
 0x749   : > { %v3115_v6 = vsel %vm754_vm2, %v3067_v24, 0.0 }
 0x74a   : > { %v3065_v9 = vpop.permute.xlu1 %3064 }
 0x74b   : > { %v3112_v13 = vsel %vm754_vm2, %v3065_v9, 0.0 }
 0x75f   : > { %2981 = vadd.xlane.f32.xlu0 %v2980_v58  ;;  %v4016_v58 = vld [vmem:[%s4223_s15 + $0x68] sm:$0xff] }
 0x760   : > { %v2853_v4 = vsub.f32 %v2837_v62, %v4016_v58 }
 0x762   : > { %v2965_v2 = vmul.f32 %v2853_v4, %v2853_v4 }
 0x764   : > { %v3007_v27 = vsel %vm366_vm0, %v2965_v2, 0.0 }
 0x76a   : > { %2990 = vadd.xlane.f32.xlu1 %v2989_v10  ;;  %v3001_v10 = vsel %vm366_vm0, %v2963_v57, 0.0 }
 0x775   : > { %3078 = vrot.lane.b32.xlu0 %v3039_v37, %s4093_s19  ;;  %v2848_v37 = vsub.f32 %v2832_v19, %v4018_v8  ;;  %v2951_v19 = vsub.f32 %v2839_v55, %v4927_v0 }
 0x777   : > { %v2960_v3 = vmul.f32 %v2848_v37, %v2848_v37  ;;  %v3047_v47 = vmul.f32 %v2951_v19, %v2951_v19  ;;  %v3208_v37 = vlaneseq }
 0x779   : > { %v3211_v30 = vshrl.u32 %v3208_v37, 7 }
 0x77b   : > { %3076 = vrot.lane.b32.xlu1 %v3038_v45, %s4093_s19  ;;  %v2992_v45 = vsel %vm366_vm0, %v2960_v3, 0.0  ;;  %v3209_v3 = vand.u32 127, %v3208_v37 }
 0x77e   : > { %v5007_v49 = vpop.xlane.xlu0 %2972 }
 0x77f   : > { %3080 = vrot.lane.b32.xlu1 %v3040_v15, %s4093_s19  ;;  %v2949_v15 = vsub.f32 %v2837_v62, %v4925_v34 }
 0x781   : > { %v3045_v63 = vmul.f32 %v2949_v15, %v2949_v15 }
 0x782   : > { %v3071_v16 = vpop.permute.xlu0 %3070 }
 0x783   : > { %3084 = vrot.lane.b32.xlu1 %v3042_v36, %s4093_s19  ;;  %v3121_v7 = vsel %vm754_vm2, %v3071_v16, 0.0 }
 0x785   : > { %v5029_v34 = vpop.xlane.xlu1 %2969 }
 0x786   : > { %v3016_v19 = vmul.f32 0.0078125, %v5029_v34 }
 0x787   : > { %3088 = vrot.lane.b32.xlu1 %v3044_v11, %s4093_s19  ;;  %v4019_v11 = vld [vmem:[%s4223_s15 + $0x50] sm:$0xff]  ;;  %s3408_s15 = sshll.u32 %s5161_s25, 3 }
 0x788   : > { %v2850_v0 = vsub.f32 %v2834_v20, %v4019_v11  ;;  %v5083_v11 = vsub.s32 %v3209_v3, %v3211_v30  ;;  %s321_s8 = scalar_lea.vmem %s5148_s6, %s3408_s15 }
 0x789   : > { %v5031_v53 = vpop.xlane.xlu1 %2978 }
 0x78b   : > { %3092 = vrot.lane.b32.xlu1 %v3046_v42, %s4093_s19  ;;  %v2962_v42 = vmul.f32 %v2850_v0, %v2850_v0 }
 0x78d   : > { %v3069_v52 = vpop.permute.xlu1 %3068  ;;  %v2998_v17 = vsel %vm366_vm0, %v2962_v42, 0.0 }
 0x78e   : > { %v3118_v38 = vsel %vm754_vm2, %v3069_v52, 0.0  ;;  %v3019_v52 = vmul.f32 0.0078125, %v5031_v53 }
 0x794   : > { %2987 = vadd.xlane.f32.xlu0 %v2986_v28  ;;  %v2964_v28 = vmul.f32 %v2852_v18, %v2852_v18 }
 0x796   : > { %v3004_v41 = vsel %vm366_vm0, %v2964_v28, 0.0 }
 0x7aa   : > { %3082 = vrot.lane.b32.xlu0 %v3041_v14, %s4093_s19 }
 0x7af   : > { %2996 = vadd.xlane.f32.xlu1 %v2995_v48 }
 0x7b3   : > { %3002 = vadd.xlane.f32.xlu1 %v3001_v10  ;;  %v5011_v31 = vpop.xlane.xlu0 %2975 }
 0x7b4   : > { %v3018_v18 = vmul.f32 0.0078125, %v5011_v31 }
 0x7b7   : > { %3008 = vadd.xlane.f32.xlu1 %v3007_v27  ;;  %v3075_v35 = vpop.permute.xlu0 %3074 }
 0x7b8   : > { %v3127_v39 = vsel %vm754_vm2, %v3075_v35, 0.0 }
 0x7bb   : > { %3014 = vadd.xlane.f32.xlu1 %v3013_v33 }
 0x7be   : > { %v5039_v22 = vpop.xlane.xlu1 %2984 }
 0x7bf   : > { %3116 = vadd.xlane.f32.xlu1 %v3115_v6  ;;  %v3021_v1 = vmul.f32 0.0078125, %v5039_v22 }
 0x7c2   : > { %v3073_v56 = vpop.permute.xlu1 %3072 }
 0x7c3   : > { %3122 = vadd.xlane.f32.xlu1 %v3121_v7  ;;  %v3124_v46 = vsel %vm754_vm2, %v3073_v56, 0.0 }
 0x7c7   : > { %3128 = vadd.xlane.f32.xlu1 %v3127_v39 }
 0x7c9   : > { %2993 = vadd.xlane.f32.xlu0 %v2992_v45 }
 0x7df   : > { %3086 = vrot.lane.b32.xlu0 %v3043_v43, %s4093_s19  ;;  %v3214_v43 = vadd.s32 4294967288, %v3209_v3 }
 0x7e3   : > { %3090 = vrot.lane.b32.xlu0 %v3045_v63, %s4093_s19  ;;  %v3017_v63 = vmul.f32 0.0078125, %v5007_v49 }
 0x7e7   : > { %3094 = vrot.lane.b32.xlu0 %v3047_v47, %s4093_s19 }
 0x7e8   : > { %v5026_v23 = vpop.xlane.xlu0 %2981 }
 0x7e9   : > { %v3020_v53 = vmul.f32 0.0078125, %v5026_v23 }
 0x7ec   : > { %v3079_v36 = vpop.permute.xlu0 %3078 }
 0x7ed   : > { %v3133_v50 = vsel %vm754_vm2, %v3079_v36, 0.0 }
 0x7ee   : > { %3134 = vadd.xlane.f32.xlu1 %v3133_v50  ;;  %v5081_v50 = vsub.s32 %v3214_v43, %v3211_v30 }
 0x7f3   : > { %v5046_v20 = vpop.xlane.xlu1 %2990 }
 0x7f7   : > { %v3077_v61 = vpop.permute.xlu1 %3076 }
 0x7f8   : > { %v3130_v32 = vsel %vm754_vm2, %v3077_v61, 0.0 }
 0x7fb   : > { %v3081_v40 = vpop.permute.xlu1 %3080 }
 0x7fc   : > { %v3136_v59 = vsel %vm754_vm2, %v3081_v40, 0.0 }
 0x7ff   : > { %v3085_v26 = vpop.permute.xlu1 %3084 }
 0x800   : > { %v3142_v57 = vsel %vm754_vm2, %v3085_v26, 0.0 }
 0x803   : > { %v3089_v5 = vpop.permute.xlu1 %3088 }
 0x804   : > { %v3148_v58 = vsel %vm754_vm2, %v3089_v5, 0.0 }
 0x806   : > { %2999 = vadd.xlane.f32.xlu0 %v2998_v17 }
 0x807   : > { %v3093_v4 = vpop.permute.xlu1 %3092 }
 0x808   : > { %v3154_v55 = vsel %vm754_vm2, %v3093_v4, 0.0 }
 0x80a   : > { %3005 = vadd.xlane.f32.xlu0 %v3004_v41 }
 0x80e   : > { %3011 = vadd.xlane.f32.xlu0 %v3010_v12 }
 0x812   : > { %3113 = vadd.xlane.f32.xlu0 %v3112_v13 }
 0x816   : > { %3119 = vadd.xlane.f32.xlu0 %v3118_v38 }
 0x81a   : > { %3125 = vadd.xlane.f32.xlu0 %v3124_v46 }
 0x81d   : > { %v5053_v14 = vpop.xlane.xlu0 %2987 }
 0x81e   : > { %3131 = vadd.xlane.f32.xlu0 %v3130_v32  ;;  %v3023_v32 = vmul.f32 0.0078125, %v5046_v20  ;;  %v3022_v22 = vmul.f32 0.0078125, %v5053_v14 }
 0x821   : > { %v3083_v21 = vpop.permute.xlu0 %3082 }
 0x822   : > { %v3139_v62 = vsel %vm754_vm2, %v3083_v21, 0.0  ;;  %3137 = vadd.xlane.f32.xlu0 %v3136_v59 }
 0x823   : > { %3140 = vadd.xlane.f32.xlu1 %v3139_v62 }
 0x826   : > { %3143 = vadd.xlane.f32.xlu0 %v3142_v57 }
 0x82a   : > { %3149 = vadd.xlane.f32.xlu0 %v3148_v58 }
 0x82e   : > { %3155 = vadd.xlane.f32.xlu0 %v3154_v55 }
 0x838   : > { %v5065_v27 = vpop.xlane.xlu1 %2996 }
 0x83c   : > { %v5067_v16 = vpop.xlane.xlu1 %3002 }
 0x840   : > { %v5069_v33 = vpop.xlane.xlu1 %3008 }
 0x844   : > { %v5071_v6 = vpop.xlane.xlu1 %3014 }
 0x848   : > { %v3117_v7 = vpop.xlane.xlu1 %3116 }
 0x849   : > { %v3161_v15 = vmul.f32 0.00390625, %v3117_v7 }
 0x84b   : > { %v3177_v9 = vadd.f32 %v3161_v15, %v3017_v63 }
 0x84c   : > { %v3123_v39 = vpop.xlane.xlu1 %3122 }
 0x84d   : > { %v3163_v47 = vmul.f32 0.00390625, %v3123_v39  ;;  %v3218_v49 = vrot.slane %v3177_v9, %v5081_v50  ;;  %v3027_v9 = vmul.f32 0.0078125, %v5067_v16 }
 0x84f   : > { %v3179_v28 = vadd.f32 %v3163_v47, %v3019_v52 }
 0x850   : > { %v3129_v42 = vpop.xlane.xlu1 %3128 }
 0x851   : > { %v3165_v34 = vmul.f32 0.00390625, %v3129_v42  ;;  %v3228_v13 = vrot.slane %v3179_v28, %v5081_v50 }
 0x852   : > { %v5060_v48 = vpop.xlane.xlu0 %2993 }
 0x853   : > { %v3181_v61 = vadd.f32 %v3165_v34, %v3021_v1 }
 0x855   : > { %v3237_v23 = vrot.slane %v3181_v61, %v5081_v50 }
 0x856   : > { %v3087_v24 = vpop.permute.xlu0 %3086 }
 0x857   : > { %v3145_v2 = vsel %vm754_vm2, %v3087_v24, 0.0 }
 0x858   : > { %3146 = vadd.xlane.f32.xlu1 %v3145_v2  ;;  %v3024_v2 = vmul.f32 0.0078125, %v5060_v48 }
 0x85a   : > { %v3091_v25 = vpop.permute.xlu0 %3090 }
 0x85b   : > { %v3151_v29 = vsel %vm754_vm2, %v3091_v25, 0.0 }
 0x85c   : > { %3152 = vadd.xlane.f32.xlu1 %v3151_v29 }
 0x85e   : > { %v3095_v10 = vpop.permute.xlu0 %3094 }
 0x85f   : > { %v3157_v54 = vsel %vm754_vm2, %v3095_v10, 0.0 }
 0x860   : > { %3158 = vadd.xlane.f32.xlu1 %v3157_v54  ;;  %v3025_v54 = vmul.f32 0.0078125, %v5065_v27 }
 0x877   : > { %v3135_v56 = vpop.xlane.xlu1 %3134 }
 0x878   : > { %v3167_v38 = vmul.f32 0.00390625, %v3135_v56 }
 0x87a   : > { %v3183_v5 = vadd.f32 %v3167_v38, %v3023_v32 }
 0x87c   : > { %v3246_v25 = vrot.slane %v3183_v5, %v5081_v50 }
 0x88f   : > { %v5073_v8 = vpop.xlane.xlu0 %2999 }
 0x893   : > { %v5075_v35 = vpop.xlane.xlu0 %3005 }
 0x894   : > { %v3028_v28 = vmul.f32 0.0078125, %v5075_v35 }
 0x897   : > { %v5077_v45 = vpop.xlane.xlu0 %3011 }
 0x898   : > { %v3030_v1 = vmul.f32 0.0078125, %v5077_v45 }
 0x89b   : > { %v3114_v36 = vpop.xlane.xlu0 %3113 }
 0x89c   : > { %v3160_v0 = vmul.f32 0.00390625, %v3114_v36 }
 0x89e   : > { %v3176_v51 = vadd.f32 %v3160_v0, %v3016_v19 }
 0x89f   : > { %v3120_v60 = vpop.xlane.xlu0 %3119 }
 0x8a0   : > { %v3213_v44 = vrot.slane %v3176_v51, %v5083_v11  ;;  %v3162_v17 = vmul.f32 0.00390625, %v3120_v60  ;;  %v3026_v51 = vmul.f32 0.0078125, %v5073_v8 }
 0x8a2   : > { %v3220_v41 = vsel %vm3219_vm3, %v3218_v49, %v3213_v44  ;;  %v3178_v12 = vadd.f32 %v3162_v17, %v3018_v18  ;;  %v3029_v49 = vmul.f32 0.0078125, %v5069_v33 }
 0x8a3   : > { %v3126_v31 = vpop.xlane.xlu0 %3125 }
 0x8a4   : > { %v3224_v40 = vrot.slane %v3178_v12, %v5083_v11  ;;  %v3164_v46 = vmul.f32 0.00390625, %v3126_v31  ;;  %v3031_v12 = vmul.f32 0.0078125, %v5071_v6 }
 0x8a6   : > { %v3229_v26 = vsel %vm3219_vm3, %v3228_v13, %v3224_v40  ;;  %v3180_v59 = vadd.f32 %v3164_v46, %v3020_v53 }
 0x8a7   : > { %v3285_v21 = vsel %vm3284_vm4, %v3229_v26, %v3220_v41  ;;  %v3132_v62 = vpop.xlane.xlu0 %3131 }
 0x8a8   : > { %v3233_v57 = vrot.slane %v3180_v59, %v5083_v11  ;;  %v3166_v58 = vmul.f32 0.00390625, %v3132_v62 }
 0x8aa   : > { %v3238_v4 = vsel %vm3219_vm3, %v3237_v23, %v3233_v57  ;;  %v3182_v55 = vadd.f32 %v3166_v58, %v3022_v22 }
 0x8ab   : > { %v3287_v24 = vsel %vm3286_vm5, %v3238_v4, %v3285_v21  ;;  %v3138_v20 = vpop.xlane.xlu0 %3137 }
 0x8ac   : > { %v3242_v14 = vrot.slane %v3182_v55, %v5083_v11  ;;  %v3168_v29 = vmul.f32 0.00390625, %v3138_v20  ;;  %v3141_v10 = vpop.xlane.xlu1 %3140 }
 0x8ad   : > { %v3169_v37 = vmul.f32 0.00390625, %v3141_v10 }
 0x8ae   : > { %v3247_v7 = vsel %vm3219_vm3, %v3246_v25, %v3242_v14  ;;  %v3184_v3 = vadd.f32 %v3168_v29, %v3024_v2 }
 0x8af   : > { %v3289_v39 = vsel %vm3288_vm6, %v3247_v7, %v3287_v24  ;;  %v3185_v30 = vadd.f32 %v3169_v37, %v3025_v54  ;;  %v3144_v19 = vpop.xlane.xlu0 %3143 }
 0x8b0   : > { %v3251_v43 = vrot.slane %v3184_v3, %v5083_v11  ;;  %v3170_v27 = vmul.f32 0.00390625, %v3144_v19 }
 0x8b1   : > { %v3255_v15 = vrot.slane %v3185_v30, %v5081_v50 }
 0x8b2   : > { %v3186_v34 = vadd.f32 %v3170_v27, %v3026_v51 }
 0x8b3   : > { %v3256_v48 = vsel %vm3219_vm3, %v3255_v15, %v3251_v43  ;;  %v3150_v47 = vpop.xlane.xlu0 %3149 }
 0x8b4   : > { %v3291_v63 = vsel %vm3290_vm7, %v3256_v48, %v3289_v39  ;;  %v3172_v52 = vmul.f32 0.00390625, %v3150_v47  ;;  %v3260_v8 = vrot.slane %v3186_v34, %v5083_v11 }
 0x8b6   : > { %v3188_v56 = vadd.f32 %v3172_v52, %v3028_v28 }
 0x8b7   : > { %v3156_v42 = vpop.xlane.xlu0 %3155 }
 0x8b8   : > { %v3174_v44 = vmul.f32 0.00390625, %v3156_v42  ;;  %v3269_v33 = vrot.slane %v3188_v56, %v5083_v11 }
 0x8ba   : > { %v3190_v13 = vadd.f32 %v3174_v44, %v3030_v1 }
 0x8bc   : > { %v3278_v6 = vrot.slane %v3190_v13, %v5083_v11 }
 0x8e1   : > { %v3147_v36 = vpop.xlane.xlu1 %3146 }
 0x8e2   : > { %v3171_v0 = vmul.f32 0.00390625, %v3147_v36 }
 0x8e4   : > { %v3187_v18 = vadd.f32 %v3171_v0, %v3027_v9 }
 0x8e5   : > { %v3153_v60 = vpop.xlane.xlu1 %3152 }
 0x8e6   : > { %v3173_v17 = vmul.f32 0.00390625, %v3153_v60  ;;  %v3264_v16 = vrot.slane %v3187_v18, %v5081_v50 }
 0x8e8   : > { %v3189_v41 = vadd.f32 %v3173_v17, %v3029_v49  ;;  %v3265_v61 = vsel %vm3219_vm3, %v3264_v16, %v3260_v8 }
 0x8e9   : > { %v3159_v53 = vpop.xlane.xlu1 %3158  ;;  %v3293_v46 = vsel %vm3292_vm8, %v3265_v61, %v3291_v63 }
 0x8ea   : > { %v3273_v35 = vrot.slane %v3189_v41, %v5081_v50  ;;  %v3175_v31 = vmul.f32 0.00390625, %v3159_v53 }
 0x8ec   : > { %v3191_v38 = vadd.f32 %v3175_v31, %v3031_v12  ;;  %v3274_v45 = vsel %vm3219_vm3, %v3273_v35, %v3269_v33 }
 0x8ed   : > { %v3295_v26 = vsel %vm3294_vm9, %v3274_v45, %v3293_v46 }
 0x8ee   : > { %v3282_v40 = vrot.slane %v3191_v38, %v5081_v50 }
 0x8f0   : > { %v3283_v32 = vsel %vm3219_vm3, %v3282_v40, %v3278_v6 }
 0x8f1   : > { %v3297_v59 = vsel %vm3296_vm10, %v3283_v32, %v3295_v26 }
 0x8f2   : > { %v3299_v22 = vsel %vm754_vm2, %v3297_v59, 0.0 }
 0x8f3   : > { %3300 = vadd.xlane.f32.xlu0 %v3299_v22 }
 0x97c   : > { %v3301_v11 = vpop.xlane.xlu0 %3300 }
 0x97d   : > { %3303 = vst.msk [vmem:[%s321_s8] sm:$0xff] %vm3302_vm11, %v3301_v11 }
 0x97e PF: > { %p16_p1 = scmp.ge.s32.totalorder %s4151_s26, 4   ;;  %s5154_s21 = smov %s4076_s22 }
 0x97f   : > { %s5155_s22 = smov %s4080_s23  ;;  %s5156_s23 = smov %s4161_s29 }
 0x980   : > { %s5157_s24 = smov %s4151_s26  ;;  %18 = sbr.rel (!%p16_p1) target bundleno = 3 (0x3), region = 90 }
 0x985   :  { %3323 = vsyncpa [#allocation3], 1 }
 0x986   :  { %3325 = vsyncpa [#allocation3 + $0x1], 1 }

</bundles_post_ra>
